<compile_context>
chip_gen: v6e
topology: v6e:2x2x1
jax: 0.10.0
libtpu: 0.0.40
codegen_flags: <defaults>
</compile_context>

<pallas_src>
import functools

import jax
import jax.numpy as jnp
from jax.experimental import pallas as pl
from jax.experimental.pallas import tpu as pltpu


_K = 7            # SpatialAttention conv kernel size
_P = 3            # "same" padding
_TAPS = 2 * _K    # 2 conv input channels (avg, max) x 7 horizontal taps


def _spatial_attention_block_kernel(w1_ref, w2_ref, colm_ref, rowm_ref,
                                    x1_ref, x2_ref, o1_ref, o2_ref, *, W, eps):
    """Block shapes:
         w*_ref:   (8, 16)       conv weights, row = ky, col = kx*2 + c (zero padded)
         colm_ref: (7, H*W)      horizontal zero-padding validity masks
         rowm_ref: (7, H*W)      vertical zero-padding validity masks
         x*_ref:   (1, C, H*W)   one batch element, lane-dense
         o*_ref:   (1, C, H*W)
    """
    _, C, HW = x1_ref.shape
    col_masks = colm_ref[...]                              # (7, HW) f32
    row_masks = rowm_ref[...]                              # (7, HW) f32

    def conv_logits(x_ref, w_ref):
        # Channel mean / max -> the 2-channel conv input, kept lane-dense.
        x = x_ref[0].astype(jnp.float32)                   # (C, HW)
        avg = jnp.mean(x, axis=0, keepdims=True)           # (1, HW)
        mx = jnp.max(x, axis=0, keepdims=True)             # (1, HW)
        feat = jnp.concatenate([avg, mx], axis=0)          # (2, HW): row0=avg, row1=max

        # dx taps on the XLU: flat roll by -dx; the masks zero lanes whose source
        # column crossed an image-row boundary (== the conv's horizontal padding).
        taps = []
        for i in range(_K):
            dx = i - _P
            if dx == 0:
                taps.append(feat)
            else:
                shifted = pltpu.roll(feat, (-dx) % HW, axis=1)
                taps.append(shifted * col_masks[i:i + 1])
        taps.append(jnp.zeros_like(feat))                  # pad contraction dim 14 -> 16
        taps = jnp.concatenate(taps, axis=0)               # (16, HW), row = kx*2 + c

        # All (c, kx) taps for all 7 ky rows in ONE small MXU contraction.
        m = jnp.dot(w_ref[...], taps,
                    precision=jax.lax.Precision.HIGHEST,
                    preferred_element_type=jnp.float32)     # (8, HW); rows 0..6 valid

        # dy contraction: flat roll by -dy*W (XLU) + vertical zero padding via masks.
        att = m[_P:_P + 1]                                  # dy == 0 term (no shift/mask)
        for j in range(_K):
            dy = j - _P
            if dy == 0:
                continue
            shifted = pltpu.roll(m[j:j + 1], (-dy * W) % HW, axis=1)
            att = att + shifted * row_masks[j:j + 1]
        return att                                          # (1, HW) conv logits

    att1 = conv_logits(x1_ref, w1_ref)
    att2 = conv_logits(x2_ref, w2_ref)

    e1 = jnp.exp(att1)
    e2 = jnp.exp(att2)
    inv = pl.reciprocal(e1 + e2 + jnp.float32(eps), approx=False)   # 1 recip, 2 muls
    o1_ref[0] = ((e1 * inv) * x1_ref[0].astype(jnp.float32)).astype(o1_ref.dtype)
    o2_ref[0] = ((e2 * inv) * x2_ref[0].astype(jnp.float32)).astype(o2_ref.dtype)


def _weight_matrix(w_oihw):
    """PyTorch Conv2d(2,1,7,bias=False) weight (1,2,7,7) OIHW -> (8,16) f32:
       row = ky, col = kx*2 + c, zero-padded to an MXU/sublane-friendly shape."""
    w = jnp.asarray(w_oihw, jnp.float32)[0]                       # (2, 7, 7) [c, ky, kx]
    wm = jnp.transpose(w, (1, 2, 0)).reshape(_K, _TAPS)           # (7, 14) [ky, kx*2+c]
    return jnp.pad(wm, ((0, 8 - _K), (0, 16 - _TAPS)))            # (8, 16)


def _pad_masks(H, W):
    """Validity masks realizing the conv's zero padding in the flat (H*W,) layout."""
    idx = jnp.arange(H * W, dtype=jnp.int32)
    xc, yr = idx % W, idx // W
    col = jnp.stack([(xc + (i - _P) >= 0) & (xc + (i - _P) < W) for i in range(_K)])
    row = jnp.stack([(yr + (j - _P) >= 0) & (yr + (j - _P) < H) for j in range(_K)])
    return col.astype(jnp.float32), row.astype(jnp.float32)        # each (7, H*W)


def spatial_attention_block(x1, x2, w1_oihw, w2_oihw, *, eps=1e-10):
    """Fused SpatialAttentionBlock forward.  x*: (N,C,H,W), w*: (1,2,7,7) OIHW."""
    assert x1.shape == x2.shape
    N, C, H, W = x1.shape
    HW = H * W

    # Lane-dense views (free, contiguous reshapes) + host-precomputed constants.
    x1f = x1.reshape(N, C, HW)
    x2f = x2.reshape(N, C, HW)
    w1_mat = _weight_matrix(w1_oihw)
    w2_mat = _weight_matrix(w2_oihw)
    col_masks, row_masks = _pad_masks(H, W)

    kernel = functools.partial(_spatial_attention_block_kernel, W=W, eps=float(eps))
    const_map = lambda n: (0, 0)            # constants: DMA'd once, never re-copied
    batch_map = lambda n: (n, 0, 0)

    o1, o2 = pl.pallas_call(
        kernel,
        out_shape=(jax.ShapeDtypeStruct((N, C, HW), x1.dtype),
                   jax.ShapeDtypeStruct((N, C, HW), x2.dtype)),
        grid=(N,),
        in_specs=[
            pl.BlockSpec((8, 16), const_map),            # w1 (padded)
            pl.BlockSpec((8, 16), const_map),            # w2 (padded)
            pl.BlockSpec((_K, HW), const_map),           # horizontal pad masks
            pl.BlockSpec((_K, HW), const_map),           # vertical pad masks
            pl.BlockSpec((1, C, HW), batch_map),         # x1[n]
            pl.BlockSpec((1, C, HW), batch_map),         # x2[n]
        ],
        out_specs=(
            pl.BlockSpec((1, C, HW), batch_map),
            pl.BlockSpec((1, C, HW), batch_map),
        ),
        compiler_params=pltpu.CompilerParams(
            dimension_semantics=("parallel",)),
    )(w1_mat, w2_mat, col_masks, row_masks, x1f, x2f)

    return o1.reshape(N, C, H, W), o2.reshape(N, C, H, W)


def _reference(x1, x2, w1_oihw, w2_oihw, eps=1e-10):
    """Exact pure-JAX reference (explicit conv taps in f32)."""
    def spatial_attention(x, w):
        N, C, H, W = x.shape
        avg = jnp.mean(x.astype(jnp.float32), axis=1)
        mx = jnp.max(x.astype(jnp.float32), axis=1)
        feat = jnp.stack([avg, mx], axis=1)                        # (N, 2, H, W)
        fp = jnp.pad(feat, ((0, 0), (0, 0), (_P, _P), (_P, _P)))
        att = jnp.zeros((N, H, W), jnp.float32)
        for c in range(2):
            for ky in range(_K):
                for kx in range(_K):
                    att = att + w[0, c, ky, kx] * fp[:, c, ky:ky + H, kx:kx + W]
        return att[:, None]                                        # (N, 1, H, W)

    a1 = spatial_attention(x1, w1_oihw)
    a2 = spatial_attention(x2, w2_oihw)
    e1, e2 = jnp.exp(a1), jnp.exp(a2)
    m1 = e1 / (e1 + e2 + eps)
    m2 = e2 / (e2 + e1 + eps)
    return m1 * x1, m2 * x2


if __name__ == "__main__":
    key = jax.random.PRNGKey(0)
    k_w1, k_w2, k_x1, k_x2 = jax.random.split(key, 4)

    N, C, H, W = 2, 4, 16, 16
    fan_in = 2 * _K * _K
    bound = 1.0 / float(fan_in) ** 0.5
    # PyTorch Conv2d(2, 1, 7, bias=False) weight layout: (out=1, in=2, 7, 7)
    w1 = jax.random.uniform(k_w1, (1, 2, _K, _K), jnp.float32, -bound, bound)
    w2 = jax.random.uniform(k_w2, (1, 2, _K, _K), jnp.float32, -bound, bound)
    x1 = jax.random.normal(k_x1, (N, C, H, W), jnp.float32)
    x2 = jax.random.normal(k_x2, (N, C, H, W), jnp.float32)

    y1, y2 = spatial_attention_block(x1, x2, w1, w2)
    jax.block_until_ready((y1, y2))

    r1, r2 = _reference(x1, x2, w1, w2)
    assert y1.shape == (N, C, H, W) and y2.shape == (N, C, H, W)
    assert jnp.allclose(y1, r1, atol=1e-3, rtol=1e-3), float(jnp.max(jnp.abs(y1 - r1)))
    assert jnp.allclose(y2, r2, atol=1e-3, rtol=1e-3), float(jnp.max(jnp.abs(y2 - r2)))

    print("KERNEL_OK")
</pallas_src>

<mosaic_0001>
module attributes {stable_mosaic.version = 11 : i64} {
  func.func @_spatial_attention_block_kernel(%arg0: i32, %arg1: memref<8x16xf32, #tpu.memory_space<vmem>>, %arg2: memref<8x16xf32, #tpu.memory_space<vmem>>, %arg3: memref<7x256xf32, #tpu.memory_space<vmem>>, %arg4: memref<7x256xf32, #tpu.memory_space<vmem>>, %arg5: memref<1x4x256xf32, #tpu.memory_space<vmem>>, %arg6: memref<1x4x256xf32, #tpu.memory_space<vmem>>, %arg7: memref<1x4x256xf32, #tpu.memory_space<vmem>>, %arg8: memref<1x4x256xf32, #tpu.memory_space<vmem>>) attributes {dimension_semantics = [#tpu.dimension_semantics<parallel>], iteration_bounds = array<i64: 2>, scalar_prefetch = 0 : i64, scratch_operands = 0 : i64, tpu.core_type = #tpu.core_type<tc>, window_params = [{pipeline_mode = #tpu.pipeline_mode<synchronous>, transform_indices = @transform_0, window_bounds = array<i64: 8, 16>}, {pipeline_mode = #tpu.pipeline_mode<synchronous>, transform_indices = @transform_1, window_bounds = array<i64: 8, 16>}, {pipeline_mode = #tpu.pipeline_mode<synchronous>, transform_indices = @transform_2, window_bounds = array<i64: 7, 256>}, {pipeline_mode = #tpu.pipeline_mode<synchronous>, transform_indices = @transform_3, window_bounds = array<i64: 7, 256>}, {transform_indices = @transform_4, window_bounds = array<i64: 1, 4, 256>}, {transform_indices = @transform_5, window_bounds = array<i64: 1, 4, 256>}, {transform_indices = @transform_6, window_bounds = array<i64: 1, 4, 256>}, {transform_indices = @transform_7, window_bounds = array<i64: 1, 4, 256>}]} {
    %c0 = arith.constant 0 : index
    %c0_0 = arith.constant 0 : index
    %0 = vector.load %arg3[%c0, %c0_0] : memref<7x256xf32, #tpu.memory_space<vmem>>, vector<7x256xf32>
    %c0_1 = arith.constant 0 : index
    %c0_2 = arith.constant 0 : index
    %1 = vector.load %arg4[%c0_1, %c0_2] : memref<7x256xf32, #tpu.memory_space<vmem>>, vector<7x256xf32>
    %c0_3 = arith.constant 0 : index
    %c0_4 = arith.constant 0 : index
    %c0_5 = arith.constant 0 : index
    %2 = vector.load %arg5[%c0_3, %c0_4, %c0_5] : memref<1x4x256xf32, #tpu.memory_space<vmem>>, vector<1x4x256xf32>
    %3 = vector.shape_cast %2 : vector<1x4x256xf32> to vector<4x256xf32>
    %cst = arith.constant dense<0.000000e+00> : vector<256xf32>
    %4 = vector.multi_reduction <add>, %3, %cst [0] : vector<4x256xf32> to vector<256xf32>
    %5 = vector.shape_cast %4 : vector<256xf32> to vector<1x256xf32>
    %cst_6 = arith.constant 4.000000e+00 : f32
    %6 = vector.broadcast %cst_6 : f32 to vector<1x256xf32>
    %7 = arith.divf %5, %6 : vector<1x256xf32>
    %cst_7 = arith.constant dense<0xFF800000> : vector<256xf32>
    %8 = vector.multi_reduction <maximumf>, %3, %cst_7 [0] : vector<4x256xf32> to vector<256xf32>
    %9 = vector.shape_cast %8 : vector<256xf32> to vector<1x256xf32>
    %10 = tpu.concatenate %7, %9 in 0 : vector<1x256xf32>, vector<1x256xf32> -> vector<2x256xf32>
    %c3_i32 = arith.constant 3 : i32
    %11 = tpu.dynamic_rotate %10 by %c3_i32 dim 1 : vector<2x256xf32>, i32 -> vector<2x256xf32>
    %12 = vector.extract_strided_slice %0 {offsets = [0, 0], sizes = [1, 256], strides = [1, 1]} : vector<7x256xf32> to vector<1x256xf32>
    %13 = vector.broadcast %12 : vector<1x256xf32> to vector<2x256xf32>
    %14 = arith.mulf %11, %13 : vector<2x256xf32>
    %c2_i32 = arith.constant 2 : i32
    %15 = tpu.dynamic_rotate %10 by %c2_i32 dim 1 : vector<2x256xf32>, i32 -> vector<2x256xf32>
    %16 = vector.extract_strided_slice %0 {offsets = [1, 0], sizes = [1, 256], strides = [1, 1]} : vector<7x256xf32> to vector<1x256xf32>
    %17 = vector.broadcast %16 : vector<1x256xf32> to vector<2x256xf32>
    %18 = arith.mulf %15, %17 : vector<2x256xf32>
    %c1_i32 = arith.constant 1 : i32
    %19 = tpu.dynamic_rotate %10 by %c1_i32 dim 1 : vector<2x256xf32>, i32 -> vector<2x256xf32>
    %20 = vector.extract_strided_slice %0 {offsets = [2, 0], sizes = [1, 256], strides = [1, 1]} : vector<7x256xf32> to vector<1x256xf32>
    %21 = vector.broadcast %20 : vector<1x256xf32> to vector<2x256xf32>
    %22 = arith.mulf %19, %21 : vector<2x256xf32>
    %c255_i32 = arith.constant 255 : i32
    %23 = tpu.dynamic_rotate %10 by %c255_i32 dim 1 : vector<2x256xf32>, i32 -> vector<2x256xf32>
    %24 = vector.extract_strided_slice %0 {offsets = [4, 0], sizes = [1, 256], strides = [1, 1]} : vector<7x256xf32> to vector<1x256xf32>
    %25 = vector.broadcast %24 : vector<1x256xf32> to vector<2x256xf32>
    %26 = arith.mulf %23, %25 : vector<2x256xf32>
    %c254_i32 = arith.constant 254 : i32
    %27 = tpu.dynamic_rotate %10 by %c254_i32 dim 1 : vector<2x256xf32>, i32 -> vector<2x256xf32>
    %28 = vector.extract_strided_slice %0 {offsets = [5, 0], sizes = [1, 256], strides = [1, 1]} : vector<7x256xf32> to vector<1x256xf32>
    %29 = vector.broadcast %28 : vector<1x256xf32> to vector<2x256xf32>
    %30 = arith.mulf %27, %29 : vector<2x256xf32>
    %c253_i32 = arith.constant 253 : i32
    %31 = tpu.dynamic_rotate %10 by %c253_i32 dim 1 : vector<2x256xf32>, i32 -> vector<2x256xf32>
    %32 = vector.extract_strided_slice %0 {offsets = [6, 0], sizes = [1, 256], strides = [1, 1]} : vector<7x256xf32> to vector<1x256xf32>
    %33 = vector.broadcast %32 : vector<1x256xf32> to vector<2x256xf32>
    %34 = arith.mulf %31, %33 : vector<2x256xf32>
    %cst_8 = arith.constant 0.000000e+00 : f32
    %35 = vector.broadcast %cst_8 : f32 to vector<2x256xf32>
    %36 = tpu.concatenate %14, %18, %22, %10, %26, %30, %34, %35 in 0 : vector<2x256xf32>, vector<2x256xf32>, vector<2x256xf32>, vector<2x256xf32>, vector<2x256xf32>, vector<2x256xf32>, vector<2x256xf32>, vector<2x256xf32> -> vector<16x256xf32>
    %c0_9 = arith.constant 0 : index
    %c0_10 = arith.constant 0 : index
    %37 = vector.load %arg1[%c0_9, %c0_10] : memref<8x16xf32, #tpu.memory_space<vmem>>, vector<8x16xf32>
    %cst_11 = arith.constant dense<0.000000e+00> : vector<8x256xf32>
    %38 = tpu.matmul %37, %36, %cst_11 {dimension_numbers = #tpu.dot_dimension_numbers<[1], [0], [0], [1], [0, 0, 1, 1], [], []>, precision = #tpu.contract_precision<fp32>} : vector<8x16xf32>, vector<16x256xf32>, vector<8x256xf32> -> vector<8x256xf32>
    %39 = vector.extract_strided_slice %38 {offsets = [3, 0], sizes = [1, 256], strides = [1, 1]} : vector<8x256xf32> to vector<1x256xf32>
    %40 = vector.extract_strided_slice %38 {offsets = [0, 0], sizes = [1, 256], strides = [1, 1]} : vector<8x256xf32> to vector<1x256xf32>
    %c48_i32 = arith.constant 48 : i32
    %41 = tpu.dynamic_rotate %40 by %c48_i32 dim 1 : vector<1x256xf32>, i32 -> vector<1x256xf32>
    %42 = vector.extract_strided_slice %1 {offsets = [0, 0], sizes = [1, 256], strides = [1, 1]} : vector<7x256xf32> to vector<1x256xf32>
    %43 = arith.mulf %41, %42 : vector<1x256xf32>
    %44 = arith.addf %39, %43 : vector<1x256xf32>
    %45 = vector.extract_strided_slice %38 {offsets = [1, 0], sizes = [1, 256], strides = [1, 1]} : vector<8x256xf32> to vector<1x256xf32>
    %c32_i32 = arith.constant 32 : i32
    %46 = tpu.dynamic_rotate %45 by %c32_i32 dim 1 : vector<1x256xf32>, i32 -> vector<1x256xf32>
    %47 = vector.extract_strided_slice %1 {offsets = [1, 0], sizes = [1, 256], strides = [1, 1]} : vector<7x256xf32> to vector<1x256xf32>
    %48 = arith.mulf %46, %47 : vector<1x256xf32>
    %49 = arith.addf %44, %48 : vector<1x256xf32>
    %50 = vector.extract_strided_slice %38 {offsets = [2, 0], sizes = [1, 256], strides = [1, 1]} : vector<8x256xf32> to vector<1x256xf32>
    %c16_i32 = arith.constant 16 : i32
    %51 = tpu.dynamic_rotate %50 by %c16_i32 dim 1 : vector<1x256xf32>, i32 -> vector<1x256xf32>
    %52 = vector.extract_strided_slice %1 {offsets = [2, 0], sizes = [1, 256], strides = [1, 1]} : vector<7x256xf32> to vector<1x256xf32>
    %53 = arith.mulf %51, %52 : vector<1x256xf32>
    %54 = arith.addf %49, %53 : vector<1x256xf32>
    %55 = vector.extract_strided_slice %38 {offsets = [4, 0], sizes = [1, 256], strides = [1, 1]} : vector<8x256xf32> to vector<1x256xf32>
    %c240_i32 = arith.constant 240 : i32
    %56 = tpu.dynamic_rotate %55 by %c240_i32 dim 1 : vector<1x256xf32>, i32 -> vector<1x256xf32>
    %57 = vector.extract_strided_slice %1 {offsets = [4, 0], sizes = [1, 256], strides = [1, 1]} : vector<7x256xf32> to vector<1x256xf32>
    %58 = arith.mulf %56, %57 : vector<1x256xf32>
    %59 = arith.addf %54, %58 : vector<1x256xf32>
    %60 = vector.extract_strided_slice %38 {offsets = [5, 0], sizes = [1, 256], strides = [1, 1]} : vector<8x256xf32> to vector<1x256xf32>
    %c224_i32 = arith.constant 224 : i32
    %61 = tpu.dynamic_rotate %60 by %c224_i32 dim 1 : vector<1x256xf32>, i32 -> vector<1x256xf32>
    %62 = vector.extract_strided_slice %1 {offsets = [5, 0], sizes = [1, 256], strides = [1, 1]} : vector<7x256xf32> to vector<1x256xf32>
    %63 = arith.mulf %61, %62 : vector<1x256xf32>
    %64 = arith.addf %59, %63 : vector<1x256xf32>
    %65 = vector.extract_strided_slice %38 {offsets = [6, 0], sizes = [1, 256], strides = [1, 1]} : vector<8x256xf32> to vector<1x256xf32>
    %c208_i32 = arith.constant 208 : i32
    %66 = tpu.dynamic_rotate %65 by %c208_i32 dim 1 : vector<1x256xf32>, i32 -> vector<1x256xf32>
    %67 = vector.extract_strided_slice %1 {offsets = [6, 0], sizes = [1, 256], strides = [1, 1]} : vector<7x256xf32> to vector<1x256xf32>
    %68 = arith.mulf %66, %67 : vector<1x256xf32>
    %69 = arith.addf %64, %68 : vector<1x256xf32>
    %c0_12 = arith.constant 0 : index
    %c0_13 = arith.constant 0 : index
    %c0_14 = arith.constant 0 : index
    %70 = vector.load %arg6[%c0_12, %c0_13, %c0_14] : memref<1x4x256xf32, #tpu.memory_space<vmem>>, vector<1x4x256xf32>
    %71 = vector.shape_cast %70 : vector<1x4x256xf32> to vector<4x256xf32>
    %cst_15 = arith.constant dense<0.000000e+00> : vector<256xf32>
    %72 = vector.multi_reduction <add>, %71, %cst_15 [0] : vector<4x256xf32> to vector<256xf32>
    %73 = vector.shape_cast %72 : vector<256xf32> to vector<1x256xf32>
    %cst_16 = arith.constant 4.000000e+00 : f32
    %74 = vector.broadcast %cst_16 : f32 to vector<1x256xf32>
    %75 = arith.divf %73, %74 : vector<1x256xf32>
    %cst_17 = arith.constant dense<0xFF800000> : vector<256xf32>
    %76 = vector.multi_reduction <maximumf>, %71, %cst_17 [0] : vector<4x256xf32> to vector<256xf32>
    %77 = vector.shape_cast %76 : vector<256xf32> to vector<1x256xf32>
    %78 = tpu.concatenate %75, %77 in 0 : vector<1x256xf32>, vector<1x256xf32> -> vector<2x256xf32>
    %c3_i32_18 = arith.constant 3 : i32
    %79 = tpu.dynamic_rotate %78 by %c3_i32_18 dim 1 : vector<2x256xf32>, i32 -> vector<2x256xf32>
    %80 = vector.extract_strided_slice %0 {offsets = [0, 0], sizes = [1, 256], strides = [1, 1]} : vector<7x256xf32> to vector<1x256xf32>
    %81 = vector.broadcast %80 : vector<1x256xf32> to vector<2x256xf32>
    %82 = arith.mulf %79, %81 : vector<2x256xf32>
    %c2_i32_19 = arith.constant 2 : i32
    %83 = tpu.dynamic_rotate %78 by %c2_i32_19 dim 1 : vector<2x256xf32>, i32 -> vector<2x256xf32>
    %84 = vector.extract_strided_slice %0 {offsets = [1, 0], sizes = [1, 256], strides = [1, 1]} : vector<7x256xf32> to vector<1x256xf32>
    %85 = vector.broadcast %84 : vector<1x256xf32> to vector<2x256xf32>
    %86 = arith.mulf %83, %85 : vector<2x256xf32>
    %c1_i32_20 = arith.constant 1 : i32
    %87 = tpu.dynamic_rotate %78 by %c1_i32_20 dim 1 : vector<2x256xf32>, i32 -> vector<2x256xf32>
    %88 = vector.extract_strided_slice %0 {offsets = [2, 0], sizes = [1, 256], strides = [1, 1]} : vector<7x256xf32> to vector<1x256xf32>
    %89 = vector.broadcast %88 : vector<1x256xf32> to vector<2x256xf32>
    %90 = arith.mulf %87, %89 : vector<2x256xf32>
    %c255_i32_21 = arith.constant 255 : i32
    %91 = tpu.dynamic_rotate %78 by %c255_i32_21 dim 1 : vector<2x256xf32>, i32 -> vector<2x256xf32>
    %92 = vector.extract_strided_slice %0 {offsets = [4, 0], sizes = [1, 256], strides = [1, 1]} : vector<7x256xf32> to vector<1x256xf32>
    %93 = vector.broadcast %92 : vector<1x256xf32> to vector<2x256xf32>
    %94 = arith.mulf %91, %93 : vector<2x256xf32>
    %c254_i32_22 = arith.constant 254 : i32
    %95 = tpu.dynamic_rotate %78 by %c254_i32_22 dim 1 : vector<2x256xf32>, i32 -> vector<2x256xf32>
    %96 = vector.extract_strided_slice %0 {offsets = [5, 0], sizes = [1, 256], strides = [1, 1]} : vector<7x256xf32> to vector<1x256xf32>
    %97 = vector.broadcast %96 : vector<1x256xf32> to vector<2x256xf32>
    %98 = arith.mulf %95, %97 : vector<2x256xf32>
    %c253_i32_23 = arith.constant 253 : i32
    %99 = tpu.dynamic_rotate %78 by %c253_i32_23 dim 1 : vector<2x256xf32>, i32 -> vector<2x256xf32>
    %100 = vector.extract_strided_slice %0 {offsets = [6, 0], sizes = [1, 256], strides = [1, 1]} : vector<7x256xf32> to vector<1x256xf32>
    %101 = vector.broadcast %100 : vector<1x256xf32> to vector<2x256xf32>
    %102 = arith.mulf %99, %101 : vector<2x256xf32>
    %cst_24 = arith.constant 0.000000e+00 : f32
    %103 = vector.broadcast %cst_24 : f32 to vector<2x256xf32>
    %104 = tpu.concatenate %82, %86, %90, %78, %94, %98, %102, %103 in 0 : vector<2x256xf32>, vector<2x256xf32>, vector<2x256xf32>, vector<2x256xf32>, vector<2x256xf32>, vector<2x256xf32>, vector<2x256xf32>, vector<2x256xf32> -> vector<16x256xf32>
    %c0_25 = arith.constant 0 : index
    %c0_26 = arith.constant 0 : index
    %105 = vector.load %arg2[%c0_25, %c0_26] : memref<8x16xf32, #tpu.memory_space<vmem>>, vector<8x16xf32>
    %cst_27 = arith.constant dense<0.000000e+00> : vector<8x256xf32>
    %106 = tpu.matmul %105, %104, %cst_27 {dimension_numbers = #tpu.dot_dimension_numbers<[1], [0], [0], [1], [0, 0, 1, 1], [], []>, precision = #tpu.contract_precision<fp32>} : vector<8x16xf32>, vector<16x256xf32>, vector<8x256xf32> -> vector<8x256xf32>
    %107 = vector.extract_strided_slice %106 {offsets = [3, 0], sizes = [1, 256], strides = [1, 1]} : vector<8x256xf32> to vector<1x256xf32>
    %108 = vector.extract_strided_slice %106 {offsets = [0, 0], sizes = [1, 256], strides = [1, 1]} : vector<8x256xf32> to vector<1x256xf32>
    %c48_i32_28 = arith.constant 48 : i32
    %109 = tpu.dynamic_rotate %108 by %c48_i32_28 dim 1 : vector<1x256xf32>, i32 -> vector<1x256xf32>
    %110 = vector.extract_strided_slice %1 {offsets = [0, 0], sizes = [1, 256], strides = [1, 1]} : vector<7x256xf32> to vector<1x256xf32>
    %111 = arith.mulf %109, %110 : vector<1x256xf32>
    %112 = arith.addf %107, %111 : vector<1x256xf32>
    %113 = vector.extract_strided_slice %106 {offsets = [1, 0], sizes = [1, 256], strides = [1, 1]} : vector<8x256xf32> to vector<1x256xf32>
    %c32_i32_29 = arith.constant 32 : i32
    %114 = tpu.dynamic_rotate %113 by %c32_i32_29 dim 1 : vector<1x256xf32>, i32 -> vector<1x256xf32>
    %115 = vector.extract_strided_slice %1 {offsets = [1, 0], sizes = [1, 256], strides = [1, 1]} : vector<7x256xf32> to vector<1x256xf32>
    %116 = arith.mulf %114, %115 : vector<1x256xf32>
    %117 = arith.addf %112, %116 : vector<1x256xf32>
    %118 = vector.extract_strided_slice %106 {offsets = [2, 0], sizes = [1, 256], strides = [1, 1]} : vector<8x256xf32> to vector<1x256xf32>
    %c16_i32_30 = arith.constant 16 : i32
    %119 = tpu.dynamic_rotate %118 by %c16_i32_30 dim 1 : vector<1x256xf32>, i32 -> vector<1x256xf32>
    %120 = vector.extract_strided_slice %1 {offsets = [2, 0], sizes = [1, 256], strides = [1, 1]} : vector<7x256xf32> to vector<1x256xf32>
    %121 = arith.mulf %119, %120 : vector<1x256xf32>
    %122 = arith.addf %117, %121 : vector<1x256xf32>
    %123 = vector.extract_strided_slice %106 {offsets = [4, 0], sizes = [1, 256], strides = [1, 1]} : vector<8x256xf32> to vector<1x256xf32>
    %c240_i32_31 = arith.constant 240 : i32
    %124 = tpu.dynamic_rotate %123 by %c240_i32_31 dim 1 : vector<1x256xf32>, i32 -> vector<1x256xf32>
    %125 = vector.extract_strided_slice %1 {offsets = [4, 0], sizes = [1, 256], strides = [1, 1]} : vector<7x256xf32> to vector<1x256xf32>
    %126 = arith.mulf %124, %125 : vector<1x256xf32>
    %127 = arith.addf %122, %126 : vector<1x256xf32>
    %128 = vector.extract_strided_slice %106 {offsets = [5, 0], sizes = [1, 256], strides = [1, 1]} : vector<8x256xf32> to vector<1x256xf32>
    %c224_i32_32 = arith.constant 224 : i32
    %129 = tpu.dynamic_rotate %128 by %c224_i32_32 dim 1 : vector<1x256xf32>, i32 -> vector<1x256xf32>
    %130 = vector.extract_strided_slice %1 {offsets = [5, 0], sizes = [1, 256], strides = [1, 1]} : vector<7x256xf32> to vector<1x256xf32>
    %131 = arith.mulf %129, %130 : vector<1x256xf32>
    %132 = arith.addf %127, %131 : vector<1x256xf32>
    %133 = vector.extract_strided_slice %106 {offsets = [6, 0], sizes = [1, 256], strides = [1, 1]} : vector<8x256xf32> to vector<1x256xf32>
    %c208_i32_33 = arith.constant 208 : i32
    %134 = tpu.dynamic_rotate %133 by %c208_i32_33 dim 1 : vector<1x256xf32>, i32 -> vector<1x256xf32>
    %135 = vector.extract_strided_slice %1 {offsets = [6, 0], sizes = [1, 256], strides = [1, 1]} : vector<7x256xf32> to vector<1x256xf32>
    %136 = arith.mulf %134, %135 : vector<1x256xf32>
    %137 = arith.addf %132, %136 : vector<1x256xf32>
    %138 = math.exp %69 : vector<1x256xf32>
    %139 = math.exp %137 : vector<1x256xf32>
    %140 = arith.addf %138, %139 : vector<1x256xf32>
    %cst_34 = arith.constant 1.000000e-10 : f32
    %141 = vector.broadcast %cst_34 : f32 to vector<1x256xf32>
    %142 = arith.addf %140, %141 : vector<1x256xf32>
    %143 = tpu.reciprocal %142 : vector<1x256xf32> -> vector<1x256xf32>
    %144 = arith.mulf %138, %143 : vector<1x256xf32>
    %c0_35 = arith.constant 0 : index
    %c0_36 = arith.constant 0 : index
    %c0_37 = arith.constant 0 : index
    %145 = vector.load %arg5[%c0_35, %c0_36, %c0_37] : memref<1x4x256xf32, #tpu.memory_space<vmem>>, vector<1x4x256xf32>
    %146 = vector.shape_cast %145 : vector<1x4x256xf32> to vector<4x256xf32>
    %147 = vector.broadcast %144 : vector<1x256xf32> to vector<4x256xf32>
    %148 = arith.mulf %147, %146 : vector<4x256xf32>
    %c0_38 = arith.constant 0 : index
    %c0_39 = arith.constant 0 : index
    %c0_40 = arith.constant 0 : index
    %149 = vector.load %arg7[%c0_38, %c0_39, %c0_40] : memref<1x4x256xf32, #tpu.memory_space<vmem>>, vector<1x4x256xf32>
    %150 = vector.shape_cast %149 : vector<1x4x256xf32> to vector<4x256xf32>
    %151 = vector.shape_cast %148 : vector<4x256xf32> to vector<1x4x256xf32>
    tpu.vector_store %arg7[%c0_38, %c0_39, %c0_40], %151 {strides = array<i32>} : memref<1x4x256xf32, #tpu.memory_space<vmem>>, vector<1x4x256xf32>,
    %152 = arith.mulf %139, %143 : vector<1x256xf32>
    %c0_41 = arith.constant 0 : index
    %c0_42 = arith.constant 0 : index
    %c0_43 = arith.constant 0 : index
    %153 = vector.load %arg6[%c0_41, %c0_42, %c0_43] : memref<1x4x256xf32, #tpu.memory_space<vmem>>, vector<1x4x256xf32>
    %154 = vector.shape_cast %153 : vector<1x4x256xf32> to vector<4x256xf32>
    %155 = vector.broadcast %152 : vector<1x256xf32> to vector<4x256xf32>
    %156 = arith.mulf %155, %154 : vector<4x256xf32>
    %c0_44 = arith.constant 0 : index
    %c0_45 = arith.constant 0 : index
    %c0_46 = arith.constant 0 : index
    %157 = vector.load %arg8[%c0_44, %c0_45, %c0_46] : memref<1x4x256xf32, #tpu.memory_space<vmem>>, vector<1x4x256xf32>
    %158 = vector.shape_cast %157 : vector<1x4x256xf32> to vector<4x256xf32>
    %159 = vector.shape_cast %156 : vector<4x256xf32> to vector<1x4x256xf32>
    tpu.vector_store %arg8[%c0_44, %c0_45, %c0_46], %159 {strides = array<i32>} : memref<1x4x256xf32, #tpu.memory_space<vmem>>, vector<1x4x256xf32>,
    return
  }
  func.func @transform_0(%arg0: i32) -> (i32, i32) {
    %c0_i32 = arith.constant 0 : i32
    %c0_i32_0 = arith.constant 0 : i32
    %c0_i32_1 = arith.constant 0 : i32
    return %c0_i32, %c0_i32_0 : i32, i32
  }
  func.func @transform_1(%arg0: i32) -> (i32, i32) {
    %c0_i32 = arith.constant 0 : i32
    %c0_i32_0 = arith.constant 0 : i32
    %c0_i32_1 = arith.constant 0 : i32
    return %c0_i32, %c0_i32_0 : i32, i32
  }
  func.func @transform_2(%arg0: i32) -> (i32, i32) {
    %c0_i32 = arith.constant 0 : i32
    %c0_i32_0 = arith.constant 0 : i32
    %c0_i32_1 = arith.constant 0 : i32
    return %c0_i32, %c0_i32_0 : i32, i32
  }
  func.func @transform_3(%arg0: i32) -> (i32, i32) {
    %c0_i32 = arith.constant 0 : i32
    %c0_i32_0 = arith.constant 0 : i32
    %c0_i32_1 = arith.constant 0 : i32
    return %c0_i32, %c0_i32_0 : i32, i32
  }
  func.func @transform_4(%arg0: i32) -> (i32, i32, i32) {
    %c0_i32 = arith.constant 0 : i32
    %c0_i32_0 = arith.constant 0 : i32
    %c0_i32_1 = arith.constant 0 : i32
    return %arg0, %c0_i32, %c0_i32_0 : i32, i32, i32
  }
  func.func @transform_5(%arg0: i32) -> (i32, i32, i32) {
    %c0_i32 = arith.constant 0 : i32
    %c0_i32_0 = arith.constant 0 : i32
    %c0_i32_1 = arith.constant 0 : i32
    return %arg0, %c0_i32, %c0_i32_0 : i32, i32, i32
  }
  func.func @transform_6(%arg0: i32) -> (i32, i32, i32) {
    %c0_i32 = arith.constant 0 : i32
    %c0_i32_0 = arith.constant 0 : i32
    %c0_i32_1 = arith.constant 0 : i32
    return %arg0, %c0_i32, %c0_i32_0 : i32, i32, i32
  }
  func.func @transform_7(%arg0: i32) -> (i32, i32, i32) {
    %c0_i32 = arith.constant 0 : i32
    %c0_i32_0 = arith.constant 0 : i32
    %c0_i32_1 = arith.constant 0 : i32
    return %arg0, %c0_i32, %c0_i32_0 : i32, i32, i32
  }
}

</mosaic_0001>

<bundles_post_ra>
// kernel: tpu_custom_call.1
= control target key start
LH: loop header
LB: loop body
LE: loop exit
PB: predicated region body
PF: predicated region fallthrough
CT: control target
= control target key end

     0   :  { %s3461_s0 = inlined_call_operand.hbm [shape: f32[8,16], index: 0, kind: input, shape index: {}]   ;;  %s3462_s1 = inlined_call_operand.hbm [shape: f32[8,16], index: 1, kind: input, shape index: {}]   ;;  %s3463_s2 = inlined_call_operand.hbm [shape: f32[7,256], index: 2, kind: input, shape index: {}]   ;;  %s3464_s3 = inlined_call_operand.hbm [shape: f32[7,256], index: 3, kind: input, shape index: {}]   ;;  %s3465_s4 = inlined_call_operand.hbm [shape: f32[2,4,256], index: 4, kind: input, shape index: {}]   ;;  %s3466_s5 = inlined_call_operand.hbm [shape: f32[2,4,256], index: 5, kind: input, shape index: {}]   ;;  %s3467_s6 = inlined_call_operand.hbm [shape: f32[2,4,256], index: 6, kind: output, shape index: {0}]   ;;  %s3468_s7 = inlined_call_operand.hbm [shape: f32[2,4,256], index: 7, kind: output, shape index: {1}]  }
   0x1   :  { %3476 = sst [smem:[#allocation22_spill]] %s3461_s0 }
   0x2   :  { %3477 = sst [smem:[#allocation23_spill]] %s3462_s1 }
   0x3   :  { %13 = vsyncpa [#allocation3], 0 }
   0x4   :  { %14 = vsyncpa [#allocation6], 0 }
   0x5   :  { %15 = vsyncpa [#allocation9], 0 }
   0x6   :  { %16 = vsyncpa [#allocation4], 0 }
   0x7   :  { %18 = vsyncpa [#allocation4 + $0x1], 0 }
   0x8   :  { %19 = vsyncpa [#allocation14], 0 }
   0x9   :  { %21 = vsyncpa [#allocation14 + $0x1], 0  ;;  %s2696_s24 = smov 0   ;;  %s2698_s25 = smov 0  }
   0xa   :  { %s2700_s26 = smov 0   ;;  %s2702_s27 = smov 0  }
   0xb LB: > { %s2717_s28 = sadd.s32 4294967295, %s2633_s27   ;;  %s2207_s29 = sadd.s32 4294967294, %s2633_s27   ;;  %s2633_s27 = sphi %s2702_s27, %s3508_s27   ;;  %s2629_s26 = sphi %s2700_s26, %s3507_s26   ;;  %s2625_s25 = sphi %s2698_s25, %s3506_s25   ;;  %s2621_s24 = sphi %s2696_s24, %s3505_s24  }
   0xc   : > { %p131_p0 = scmp.ne.s32.totalorder %s2625_s25, %s2621_s24  ;;  %p3469_p1 = scmp.eq.s32.totalorder %s2717_s28, 0 }
   0xd   : > { %p187_p3 = scmp.eq.s32.totalorder %s2207_s29, 1  ;;  %p2208_p5 = scmp.ge.s32.totalorder %s2633_s27, 1 }
   0xe   : > { %p2726_p4 = por %p3469_p1, %p131_p0  ;;  %p220_p7 = scmp.lt.s32.totalorder %s2633_s27, 3 }
   0xf   : > { %p2731_p6 = por %p187_p3, %p131_p0  ;;  %s2635_s10 = smov [#allocation2]  }
  0x10   : > { %s3478_s30 = scalar_select %p2726_p4, 1, 0 }
  0x11   : > { %s3479_s8 = scalar_select %p2731_p6, 1, 0 }
  0x12   : > { %p2736_p8 = pnand %p2208_p5, %p220_p7  ;;  %s233_s11 = sshll.u32 %s2635_s10, 4  ;;  %s234_s11 = int_to_ptr.vmem [resolvable:$true] %s233_s11 }
  0x13   : > { %s2636_s12 = smov [#allocation5]   ;;  %s2750_s15 = sadd.s32 1, %s2633_s27  }
  0x14   : > { %s3480_s9 = scalar_select %p2736_p8, 1, 0 }
  0x15   : > { %p2265_p10 = pneg %p2736_p8  ;;  %s244_s13 = sshll.u32 %s2636_s12, 4  ;;  %s245_s13 = int_to_ptr.vmem [resolvable:$true] %s244_s13 }
  0x16   : > { %s115_s16 = ssub.s32 %s2633_s27, %s2750_s15  ;;  %s2378_s17 = scalar_lea.vmem %s234_s11, 128 }
  0x17   : > { %p2745_p11 = pnand %p2265_p10, %p3469_p1  ;;  %p2379_p13 = scmp.ne.s32.totalorder %s234_s11, %s2378_s17 }
  0x18   : > { %p2386_p5 = scmp.lt.s32.totalorder %s234_s11, %s234_s11  ;;  %p2387_p7 = scmp.lt.s32.totalorder %s2378_s17, %s2378_s17 }
  0x19   : > { %p3473_p12 = pneg %p2745_p11 }
  0x1a   : > { %p2388_p10 = por %p2387_p7, %p2386_p5 }
  0x1b   : > { %p2381_p0 = pnand %p2379_p13, %p3473_p12 }
  0x1d   : > { %p2382_p3 = pneg %p2381_p0 }
  0x1f   : > { %p2389_p9 = pnand %p2388_p10, %p2382_p3 }
  0x21   : > { %2392 = shalt.err (!%p2389_p9)
}
  0x22   : > { %s3482_s0 = sld [smem:[#allocation22_spill]]  ;;  %s2404_s20 = scalar_lea.vmem %s245_s13, 128 }
  0x23   : > { %p2405_p1 = scmp.ne.s32.totalorder %s245_s13, %s2404_s20  ;;  %p2412_p13 = scmp.lt.s32.totalorder %s245_s13, %s245_s13 }
  0x24   : > { %p2413_p0 = scmp.lt.s32.totalorder %s2404_s20, %s2404_s20 }
  0x25   : > { %p2407_p2 = pnand %p2405_p1, %p3473_p12 }
  0x26   : > { %p2414_p4 = por %p2413_p0, %p2412_p13 }
  0x27   : > { %p2408_p6 = pneg %p2407_p2 }
  0x28   : > { %2268 = dma.hbm_to_vmem [thread:$0]  (!%p2745_p11), %s3482_s0, 128, %s234_s11, [#allocation3]  }
  0x29   : > { %p2415_p8 = pnand %p2414_p4, %p2408_p6 }
  0x2b   : > { %2418 = shalt.err (!%p2415_p8)
}
  0x2c   : > { %s3483_s1 = sld [smem:[#allocation23_spill]]  ;;  %p116_p1 = scmp.eq.s32.totalorder %s115_s16, 0 }
  0x2d   : > { %s118_s23 = sadd.s32 1, %s2629_s26  ;;  %p125_p2 = scmp.ne.s32.totalorder %s2629_s26, %s2625_s25 }
  0x2e   : > { %p126_p4 = scmp.eq.s32.totalorder %s2633_s27, 0  ;;  %p3485_p8 = scmp.eq.s32.totalorder %s2717_s28, 1 }
  0x2f   : > { %s2777_s29 = scalar_select %p116_p1, %s2629_s26, %s118_s23  }
  0x30   : > { %p127_p6 = por %p126_p4, %p125_p2  ;;  %p2781_p9 = por %p3485_p8, %p125_p2 }
  0x31   : > { %3484 = sst [smem:[#allocation21_spill]] %s2777_s29  ;;  %p2296_p3 = scmp.lt.s32.totalorder %s2633_s27, 2 }
  0x32   : > { %2271 = dma.hbm_to_vmem [thread:$0]  (!%p2745_p11), %s3483_s1, 128, %s245_s13, [#allocation6]  }
  0x33   : > { %s3486_s10 = scalar_select %p2781_p9, 1, 0 }
  0x34   : > { %s277_s11 = sand.u32 1, %s2633_s27   ;;  %s279_s12 = sand.u32 1, %s2629_s26  }
  0x35   : > { %s2788_s17 = sshll.u32 %s279_s12, 3  ;;  %s3472_s18 = sshll.u32 %s2633_s27, 7 }
  0x36   : > { %s2796_s19 = scalar_lea.hbm %s3465_s4, %s3472_s18  ;;  %s281_s20 = scalar_lea.vmem [#allocation10], %s2788_s17 }
  0x37   : > { %s289_s21 = sshll.u32 %s281_s20, 4  ;;  %p2799_p5 = pnand %p2296_p3, %p127_p6  ;;  %s2803_s21 = int_to_ptr.vmem [resolvable:$true] %s289_s21 }
  0x38   : > { %s2637_s23 = smov [#allocation7]   ;;  %s2805_s0 = scalar_lea.sflag [#allocation3], %s277_s11 }
  0x39   : > { %s255_s12 = sshll.u32 %s2637_s23, 4  ;;  %s2419_s13 = scalar_lea.hbm %s2796_s19, 128  ;;  %s256_s12 = int_to_ptr.vmem [resolvable:$true] %s255_s12 }
  0x3a   : > { %p2420_p7 = scmp.ne.s32.totalorder %s2796_s19, %s2419_s13  ;;  %p3475_p10 = pneg %p2799_p5 }
  0x3b   : > { %s2424_s18 = scalar_lea.hbm %s3465_s4, 256  ;;  %p2425_p1 = scmp.lt.s32.totalorder %s2796_s19, %s3465_s4 }
  0x3c   : > { %p2422_p13 = pnand %p3475_p10, %p2420_p7  ;;  %p2426_p2 = scmp.lt.s32.totalorder %s2424_s18, %s2419_s13 }
  0x3e   : > { %p2423_p0 = pneg %p2422_p13  ;;  %p2427_p4 = por %p2426_p2, %p2425_p1 }
  0x40   : > { %p2428_p6 = pnand %p2427_p4, %p2423_p0 }
  0x42   : > { %2431 = shalt.err (!%p2428_p6)
}
  0x43   : > { %s2432_s11 = scalar_lea.vmem %s2803_s21, 128  ;;  %s2638_s23 = smov [#allocation10]  }
  0x44   : > { %p2433_p8 = scmp.ne.s32.totalorder %s2803_s21, %s2432_s11  ;;  %s2437_s16 = sshll.u32 %s2638_s23, 4  ;;  %s2438_s16 = int_to_ptr.vmem [resolvable:$false] %s2437_s16 }
  0x45   : > { %s2439_s20 = scalar_lea.vmem %s2438_s16, 256  ;;  %p2440_p13 = scmp.lt.s32.totalorder %s2803_s21, %s2438_s16 }
  0x46   : > { %p2435_p3 = pnand %p2433_p8, %p3475_p10  ;;  %p2441_p12 = scmp.lt.s32.totalorder %s2439_s20, %s2432_s11 }
  0x48   : > { %p2436_p7 = pneg %p2435_p3  ;;  %p2442_p9 = por %p2441_p12, %p2440_p13 }
  0x4a   : > { %p2443_p1 = pnand %p2442_p9, %p2436_p7 }
  0x4c   : > { %2446 = shalt.err (!%p2443_p1)
}
  0x4d   : > { %2281 = dma.hbm_to_vmem [thread:$0]  (!%p2799_p5), %s2796_s19, 128, %s2803_s21, %s2805_s0  }
  0x4e   : > { %s2458_s1 = scalar_lea.vmem %s256_s12, 256  ;;  %p3488_p2 = pneg %p2745_p11 }
  0x4f   : > { %p2459_p0 = scmp.ne.s32.totalorder %s256_s12, %s2458_s1  ;;  %p2466_p8 = scmp.lt.s32.totalorder %s256_s12, %s256_s12 }
  0x50   : > { %p2467_p3 = scmp.lt.s32.totalorder %s2458_s1, %s2458_s1 }
  0x51   : > { %p2461_p4 = pnand %p2459_p0, %p3488_p2 }
  0x52   : > { %p2468_p10 = por %p2467_p3, %p2466_p8 }
  0x53   : > { %p2462_p6 = pneg %p2461_p4 }
  0x55   : > { %p2469_p12 = pnand %p2468_p10, %p2462_p6 }
  0x57   : > { %2472 = shalt.err (!%p2469_p12)
}
  0x58   : > { %2274 = dma.hbm_to_vmem [thread:$0]  (!%p2745_p11), %s3463_s2, 256, %s256_s12, [#allocation6]  }
  0x59   : > { %s2639_s19 = smov [#allocation8]   ;;  %s3489_s13 = sshll.u32 %s2633_s27, 7 }
  0x5a   : > { %s266_s21 = sshll.u32 %s2639_s19, 4  ;;  %s2845_s16 = scalar_lea.hbm %s3466_s5, %s3489_s13  ;;  %s267_s21 = int_to_ptr.vmem [resolvable:$true] %s266_s21 }
  0x5b   : > { %s2484_s20 = scalar_lea.vmem %s267_s21, 256  ;;  %p3490_p10 = pmov %p3488_p2 }
  0x5c   : > { %p2485_p9 = scmp.ne.s32.totalorder %s267_s21, %s2484_s20  ;;  %p2492_p1 = scmp.lt.s32.totalorder %s267_s21, %s267_s21 }
  0x5d   : > { %p2493_p0 = scmp.lt.s32.totalorder %s2484_s20, %s2484_s20 }
  0x5e   : > { %p2487_p7 = pnand %p2485_p9, %p3490_p10 }
  0x5f   : > { %p2494_p2 = por %p2493_p0, %p2492_p1 }
  0x60   : > { %p2488_p13 = pneg %p2487_p7 }
  0x62   : > { %p2495_p4 = pnand %p2494_p2, %p2488_p13 }
  0x64   : > { %2498 = shalt.err (!%p2495_p4)
}
  0x65   : > { %2277 = dma.hbm_to_vmem [thread:$0]  (!%p2745_p11), %s3464_s3, 256, %s267_s21, [#allocation9]  }
  0x66   : > { %s300_s29 = scalar_lea.vmem [#allocation11], %s2788_s17  ;;  %s2499_s19 = scalar_lea.hbm %s2845_s16, 128 }
  0x67   : > { %s308_s18 = sshll.u32 %s300_s29, 4  ;;  %p2500_p6 = scmp.ne.s32.totalorder %s2845_s16, %s2499_s19  ;;  %s309_s18 = int_to_ptr.vmem [resolvable:$true] %s308_s18 }
  0x68   : > { %p3491_p8 = pneg %p2799_p5  ;;  %s2504_s11 = scalar_lea.hbm %s3466_s5, 256 }
  0x69   : > { %p2505_p9 = scmp.lt.s32.totalorder %s2845_s16, %s3466_s5  ;;  %p2506_p10 = scmp.lt.s32.totalorder %s2504_s11, %s2499_s19 }
  0x6a   : > { %p2502_p3 = pnand %p2500_p6, %p3491_p8 }
  0x6b   : > { %p2507_p7 = por %p2506_p10, %p2505_p9 }
  0x6c   : > { %p2503_p12 = pneg %p2502_p3 }
  0x6e   : > { %p2508_p11 = pnand %p2507_p7, %p2503_p12 }
  0x70   : > { %2511 = shalt.err (!%p2508_p11)
}
  0x71   : > { %s2512_s17 = scalar_lea.vmem %s309_s18, 128  ;;  %p3492_p1 = pmov %p3491_p8 }
  0x72   : > { %p2513_p13 = scmp.ne.s32.totalorder %s309_s18, %s2512_s17  ;;  %s2640_s21 = smov [#allocation11]  }
  0x73   : > { %s2517_s12 = sshll.u32 %s2640_s21, 4  ;;  %s2518_s12 = int_to_ptr.vmem [resolvable:$false] %s2517_s12 }
  0x74   : > { %p2515_p0 = pnand %p2513_p13, %p3492_p1  ;;  %s2519_s1 = scalar_lea.vmem %s2518_s12, 256 }
  0x75   : > { %p2520_p4 = scmp.lt.s32.totalorder %s309_s18, %s2518_s12  ;;  %p2521_p6 = scmp.lt.s32.totalorder %s2519_s1, %s2512_s17 }
  0x76   : > { %p2516_p2 = pneg %p2515_p0 }
  0x77   : > { %p2522_p8 = por %p2521_p6, %p2520_p4 }
  0x79   : > { %p2523_p3 = pnand %p2522_p8, %p2516_p2 }
  0x7b   : > { %2526 = shalt.err (!%p2523_p3)
}
  0x7c   : > { %2284 = dma.hbm_to_vmem [thread:$0]  (!%p2799_p5), %s2845_s16, 128, %s309_s18, %s2805_s0  }
  0x7d   : > { %p3493_p12 = scmp.ne.s32.totalorder %s3480_s9, 0 }
  0x7e   : > { %p3494_p9 = scmp.eq.s32.totalorder (!%p3493_p12), %s2717_s28, 0 }
  0x7f   : > { %317 = sbr.rel (%p3493_p12) target bundleno = 774 (0x306), region = 44 }
  0x84   : > { %2596 = dma.done.wait (%p3494_p9), [#allocation3], 128   ;;  %p3495_p10 = pmov %p3494_p9 }
  0x85   : > { %p3496_p7 = pmov %p3494_p9 }
  0x86   : > { %2598 = vsyncadd (%p3495_p10), [#allocation3], 4294967168 }
  0x87   : > { %2600 = dma.done.wait (%p3496_p7), [#allocation6], 384   ;;  %p3497_p11 = pmov %p3496_p7 }
  0x88   : > { %p3498_p13 = pmov %p3496_p7 }
  0x89   : > { %2602 = vsyncadd (%p3497_p11), [#allocation6], 4294966912 }
  0x8a   : > { %2604 = dma.done.wait (%p3498_p13), [#allocation9], 256   ;;  %p3499_p5 = pmov %p3496_p7 }
  0x8b   : > { %s335_s0 = sand.u32 1, %s2717_s28   ;;  %s2891_s9 = sand.u32 1, %s2625_s25  }
  0x8c   : > { %2606 = vsyncadd (%p3499_p5), [#allocation9], 4294967040  ;;  %s2894_s22 = sshll.u32 %s2891_s9, 3  ;;  %s336_s16 = scalar_lea.sflag [#allocation3], %s335_s0 }
  0x8d   : > { %s339_s29 = scalar_lea.vmem [#allocation10], %s2894_s22  ;;  %p3500_p1 = scmp.ne.s32.totalorder %s3478_s30, 0 }
  0x8f   : > { %2608 = dma.done.wait (%p3500_p1), %s336_s16, 256  }
  0x90   : > { %2610 = vsyncadd (%p3500_p1), %s336_s16, 4294967040  ;;  %vm397_vm0 = vcmask 1043456   ;;  %v393_v0 = vld [vmem:[%s339_s29] sm:$0xff]  ;;  %s348_s18 = scalar_lea.vmem [#allocation11], %s2894_s22  ;;  %vm429_vm1 = vcmask 1040384   ;;  %s2641_s30 = smov 125  }
  0x91   : > { %v1222_v1 = vld [vmem:[%s348_s18] sm:$0xff]  ;;  %v398_v2 = vsel %vm397_vm0, %v393_v0, 0.0  ;;  %v415_v3 = vsel %vm397_vm0, %v393_v0, -inf  ;;  %v2908_v4 = vcombine.high %v393_v0, %v393_v0  ;;  %s2642_s19 = smov 126   ;;  %s2643_s13 = smov 2   ;;  %vm581_vm2 = vcmask 130048  }
  0x92   : > { %v399_v5 = vrot.slane %v398_v2, 4  ;;  %v416_v6 = vrot.slane %v415_v3, 4  ;;  %v1226_v7 = vsel %vm397_vm0, %v1222_v1, 0.0  ;;  %v1224_v10 = vcombine.high %v1222_v1, %v1222_v1  ;;  %s2644_s14 = smov 127   ;;  %s2645_s11 = smov 1  }
  0x93   : > { %v405_v8 = vsel %vm397_vm0, %v2908_v4, 0.0  ;;  %v422_v9 = vsel %vm397_vm0, %v2908_v4, -inf  ;;  %v1227_v15 = vrot.slane %v1226_v7, 4  ;;  %v1242_v16 = vsel %vm397_vm0, %v1222_v1, -inf  ;;  %s2646_s23 = smov 3   ;;  %s2648_s20 = smov 48  }
  0x94   : > { %v400_v11 = vadd.f32 %v399_v5, %v398_v2  ;;  %v417_v12 = vmax.f32 %v415_v3, %v416_v6  ;;  %v406_v13 = vrot.slane %v405_v8, 4  ;;  %v423_v14 = vrot.slane %v422_v9, 4  ;;  %s2649_s17 = smov 32   ;;  %s2650_s21 = smov 16  }
  0x95   : > { %v1233_v17 = vsel %vm397_vm0, %v1224_v10, 0.0  ;;  %v1228_v26 = vadd.f32 %v1227_v15, %v1226_v7  ;;  %v1243_v27 = vrot.slane %v1242_v16, 4  ;;  %v1249_v29 = vsel %vm397_vm0, %v1224_v10, -inf  ;;  %s2651_s12 = smov 112   ;;  %s2652_s1 = smov 96  }
  0x96   : > { %v401_v18 = vrot.slane %v400_v11, 2  ;;  %v418_v19 = vrot.slane %v417_v12, 2  ;;  %v407_v20 = vadd.f32 %v406_v13, %v405_v8  ;;  %v424_v21 = vmax.f32 %v422_v9, %v423_v14  ;;  %v580_v9 = vld [vmem:[#allocation2] sm:$0xff]  ;;  %s2653_s0 = smov 80   ;;  %s2239_s16 = sshll.u32 %s2717_s28, 7 }
  0x97   : > { %v1234_v28 = vrot.slane %v1233_v17, 4  ;;  %v1229_v38 = vrot.slane %v1228_v26, 2  ;;  %v1244_v39 = vmax.f32 %v1242_v16, %v1243_v27  ;;  %v1250_v40 = vrot.slane %v1249_v29, 4  ;;  %p3501_p2 = scmp.ne.s32.totalorder %s3486_s10, 0 }
  0x98   : > { %v402_v22 = vadd.f32 %v401_v18, %v400_v11  ;;  %v419_v23 = vmax.f32 %v417_v12, %v418_v19  ;;  %v408_v24 = vrot.slane %v407_v20, 2  ;;  %v425_v25 = vrot.slane %v424_v21, 2  ;;  %v389_v19 = vld [vmem:[#allocation7] sm:$0x7f] }
  0x99   : > { %v1235_v44 = vadd.f32 %v1234_v28, %v1233_v17  ;;  %v1245_v47 = vrot.slane %v1244_v39, 2  ;;  %v1230_v49 = vadd.f32 %v1229_v38, %v1228_v26  ;;  %v1251_v51 = vmax.f32 %v1249_v29, %v1250_v40 }
  0x9a   : > { %v403_v30 = vrot.slane %v402_v22, 1  ;;  %v420_v31 = vrot.slane %v419_v23, 1  ;;  %v409_v32 = vadd.f32 %v408_v24, %v407_v20  ;;  %v426_v33 = vmax.f32 %v424_v21, %v425_v25 }
  0x9b   : > { %v1236_v50 = vrot.slane %v1235_v44, 2  ;;  %v1231_v52 = vrot.slane %v1230_v49, 1  ;;  %v1246_v53 = vmax.f32 %v1244_v39, %v1245_v47  ;;  %v1252_v55 = vrot.slane %v1251_v51, 2 }
  0x9c   : > { %v404_v34 = vadd.f32 %v403_v30, %v402_v22  ;;  %v421_v35 = vmax.f32 %v419_v23, %v420_v31  ;;  %v410_v36 = vrot.slane %v409_v32, 1  ;;  %v427_v37 = vrot.slane %v426_v33, 1  ;;  %v390_v22 = vld [vmem:[#allocation7 + $0x8] sm:$0x7f] }
  0x9d   : > { %v1237_v54 = vadd.f32 %v1236_v50, %v1235_v44  ;;  %v1232_v56 = vadd.f32 %v1231_v52, %v1230_v49  ;;  %v1247_v57 = vrot.slane %v1246_v53, 1  ;;  %v1253_v59 = vmax.f32 %v1251_v51, %v1252_v55 }
  0x9e   : > { %v413_v41 = vmul.f32 0.25, %v404_v34  ;;  %v411_v42 = vadd.f32 %v410_v36, %v409_v32  ;;  %v428_v43 = vmax.f32 %v426_v33, %v427_v37  ;;  %v2647_v5 = vmov 0.0  }
  0x9f   : > { %v1238_v58 = vrot.slane %v1237_v54, 1  ;;  %v1240_v60 = vmul.f32 0.25, %v1232_v56  ;;  %v1248_v61 = vmax.f32 %v1246_v53, %v1247_v57  ;;  %v1254_v63 = vrot.slane %v1253_v59, 1  ;;  %653 = vmatprep.mubr.f32.mxu0 %v2647_v5  ;;  %749 = vmatprep.mubr.f32.mxu1 %v2647_v5 }
  0xa0   : > { %v2919_v45 = vsel %vm429_vm1, %v413_v41, %v421_v35  ;;  %v414_v46 = vmul.f32 0.25, %v411_v42  ;;  %v436_v8 = vlaneseq  ;;  %v583_v12 = vsel %vm581_vm2, %v580_v9, 0 }
  0xa1   : > { %519 = vrot.lane.b32.xlu1 %v2919_v45, %s2641_s30  ;;  %502 = vrot.lane.b32.xlu0 %v2919_v45, %s2642_s19  ;;  %v1239_v62 = vadd.f32 %v1238_v58, %v1237_v54  ;;  %v2942_v0 = vsel %vm429_vm1, %v1240_v60, %v1248_v61  ;;  %v1255_v2 = vmax.f32 %v1253_v59, %v1254_v63  ;;  %v2977_v14 = vand.u32 4294901760, %v583_v12  ;;  %v1348_v63 = vld [vmem:[#allocation5] sm:$0xff] }
  0xa2   : > { %v2926_v48 = vsel %vm429_vm1, %v414_v46, %v428_v43  ;;  %v2975_v13 = vshrl.u32 %v436_v8, 7  ;;  %v2979_v15 = vand.u32 127, %v436_v8  ;;  %vm566_vm8 = vcmask 1041408  }
  0xa3   : > { %v1241_v1 = vmul.f32 0.25, %v1239_v62  ;;  %v2987_v23 = vsub.f32 %v583_v12, %v2977_v14  ;;  %v551_v57 = vrot.slane %v2926_v48, 2  ;;  %v550_v58 = vrot.slane %v2919_v45, 2 }
  0xa4   : > { %v528_v18 = vsub.s32 6, %v2975_v13  ;;  %v460_v20 = vsub.s32 1, %v2975_v13  ;;  %v477_v21 = vsub.s32 2, %v2975_v13  ;;  %vm455_vm3 = vcmp.lt.s32.totalorder %v2979_v15, 2 }
  0xa5   : > { %451 = vrot.lane.b32.xlu0 %v2919_v45, %s2643_s13  ;;  %521 = vrot.lane.b32.xlu1 %v2926_v48, %s2641_s30  ;;  %v2948_v3 = vsel %vm429_vm1, %v1241_v1, %v1255_v2  ;;  %v494_v25 = vsub.s32 4, %v2975_v13  ;;  %vm523_vm4 = vcmp.lt.s32.totalorder %v2979_v15, 125  ;;  %vm472_vm5 = vcmp.lt.s32.totalorder %v2979_v15, 1 }
  0xa6   : > { %v2992_v27 = vrot.slane %v389_v19, %v528_v18  ;;  %v2995_v28 = vrot.slane %v389_v19, %v460_v20  ;;  %v2997_v29 = vrot.slane %v390_v22, %v460_v20  ;;  %vm489_vm6 = vcmp.lt.s32.totalorder %v2979_v15, 127 }
  0xa7   : > { %v3000_v30 = vrot.slane %v389_v19, %v477_v21  ;;  %v443_v31 = vsub.s32 0, %v2975_v13  ;;  %v3007_v34 = vrot.slane %v390_v22, %v477_v21  ;;  %v656_v35 = vand.u32 4294901760, %v2987_v23 }
  0xa8   : > { %v3010_v36 = vrot.slane %v390_v22, %v528_v18  ;;  %v3012_v37 = vrot.slane %v389_v19, %v494_v25  ;;  %v3014_v38 = vrot.slane %v390_v22, %v494_v25  ;;  %v511_v41 = vsub.s32 5, %v2975_v13 }
  0xa9   : > { %485 = vrot.lane.b32.xlu0 %v2919_v45, %s2644_s14  ;;  %453 = vrot.lane.b32.xlu1 %v2926_v48, %s2643_s13  ;;  %vm438_vm7 = vcmp.lt.s32.totalorder %v2979_v15, 3  ;;  %v3024_v47 = vrot.slane %v389_v19, %v443_v31  ;;  %v3026_v49 = vrot.slane %v390_v22, %v443_v31  ;;  %vm506_vm9 = vcmp.lt.s32.totalorder %v2979_v15, 126 }
  0xaa   : > { %v3034_v52 = vsub.f32 %v2987_v23, %v656_v35  ;;  %v512_v55 = vrot.slane %v389_v19, %v511_v41  ;;  %v516_v56 = vrot.slane %v390_v22, %v511_v41  ;;  %vm571_vm10 = vcmask 1045504  }
  0xab   : > { %v1350_v19 = vsel %vm581_vm2, %v1348_v63, 0  ;;  %vm1080_vm11 = vcmp.lt.s32.totalorder %v2979_v15, 48  ;;  %vm1103_vm12 = vcmp.lt.s32.totalorder %v2979_v15, 32  ;;  %vm1130_vm13 = vcmp.lt.s32.totalorder %v2979_v15, 16 }
  0xac   : > { %vm1155_vm14 = vcmp.lt.s32.totalorder %v2979_v15, 112  ;;  %vm1180_vm15 = vcmp.lt.s32.totalorder %v2979_v15, 96 }
  0xad   : > { %468 = vrot.lane.b32.xlu0 %v2919_v45, %s2645_s11  ;;  %487 = vrot.lane.b32.xlu1 %v2926_v48, %s2644_s14 }
  0xb1   : > { %432 = vrot.lane.b32.xlu0 %v2919_v45, %s2646_s23  ;;  %470 = vrot.lane.b32.xlu1 %v2926_v48, %s2645_s11 }
  0xb5   : > { %1290 = vrot.lane.b32.xlu0 %v2942_v0, %s2642_s19  ;;  %434 = vrot.lane.b32.xlu1 %v2926_v48, %s2646_s23 }
  0xb9   : > { %1292 = vrot.lane.b32.xlu1 %v2948_v3, %s2642_s19  ;;  %504 = vrot.lane.b32.xlu0 %v2926_v48, %s2642_s19 }
  0xbd   : > { %1300 = vrot.lane.b32.xlu1 %v2948_v3, %s2641_s30  ;;  %1298 = vrot.lane.b32.xlu0 %v2942_v0, %s2641_s30  ;;  %s381_s30 = scalar_lea.vmem [#allocation12], %s2894_s22 }
  0xbe   : > { %s2033_s19 = sshll.u32 %s381_s30, 4  ;;  %s3392_s19 = int_to_ptr.vmem [resolvable:$true] %s2033_s19 }
  0xc1   : > { %1268 = vrot.lane.b32.xlu1 %v2948_v3, %s2643_s13  ;;  %1266 = vrot.lane.b32.xlu0 %v2942_v0, %s2643_s13 }
  0xc5   : > { %1284 = vrot.lane.b32.xlu1 %v2948_v3, %s2644_s14  ;;  %1282 = vrot.lane.b32.xlu0 %v2942_v0, %s2644_s14 }
  0xc9   : > { %1276 = vrot.lane.b32.xlu1 %v2948_v3, %s2645_s11  ;;  %1274 = vrot.lane.b32.xlu0 %v2942_v0, %s2645_s11 }
  0xcd   : > { %1260 = vrot.lane.b32.xlu1 %v2948_v3, %s2646_s23  ;;  %1258 = vrot.lane.b32.xlu0 %v2942_v0, %s2646_s23  ;;  %s3390_s23 = scalar_lea.hbm %s3467_s6, %s2239_s16 }
 0x113   : > { %v520_v6 = vpop.permute.xlu1 %519  ;;  %v2972_v7 = vpop.permute.xlu0 %502 }
 0x117   : > { %v452_v10 = vpop.permute.xlu0 %451  ;;  %v522_v11 = vpop.permute.xlu1 %521 }
 0x118   : > { %v524_v59 = vsel %vm523_vm4, %v520_v6, %v522_v11  ;;  %v525_v60 = vsel %vm523_vm4, %v522_v11, %v520_v6 }
 0x119   : > { %v534_v6 = vmul.f32 %v2992_v27, %v524_v59  ;;  %v535_v20 = vmul.f32 %v3010_v36, %v525_v60 }
 0x11b   : > { %v2981_v16 = vpop.permute.xlu0 %485  ;;  %v454_v17 = vpop.permute.xlu1 %453  ;;  %v563_v60 = vrot.slane %v535_v20, 4 }
 0x11c   : > { %v456_v32 = vsel %vm455_vm3, %v452_v10, %v454_v17  ;;  %v457_v33 = vsel %vm455_vm3, %v454_v17, %v452_v10  ;;  %v658_v10 = vand.u32 4294901760, %v3034_v52 }
 0x11d   : > { %v466_v44 = vmul.f32 %v2995_v28, %v457_v33  ;;  %v467_v46 = vmul.f32 %v2997_v29, %v456_v32 }
 0x11f   : > { %v469_v24 = vpop.permute.xlu0 %468  ;;  %v488_v26 = vpop.permute.xlu1 %487  ;;  %v538_v1 = vrot.slane %v466_v44, 6  ;;  %v539_v2 = vrot.slane %v467_v46, 6 }
 0x120   : > { %v490_v21 = vsel %vm489_vm6, %v2981_v16, %v488_v26  ;;  %v491_v25 = vsel %vm489_vm6, %v488_v26, %v2981_v16 }
 0x123   : > { %v433_v39 = vpop.permute.xlu0 %432  ;;  %v471_v40 = vpop.permute.xlu1 %470 }
 0x124   : > { %v473_v42 = vsel %vm472_vm5, %v469_v24, %v471_v40  ;;  %v474_v43 = vsel %vm472_vm5, %v471_v40, %v469_v24 }
 0x125   : > { %v483_v50 = vmul.f32 %v3000_v30, %v474_v43  ;;  %v484_v51 = vmul.f32 %v3007_v34, %v473_v42  ;;  %v500_v43 = vmul.f32 %v3012_v37, %v490_v21 }
 0x127   : > { %v1291_v53 = vpop.permute.xlu0 %1290  ;;  %v435_v54 = vpop.permute.xlu1 %434  ;;  %v544_v45 = vrot.slane %v483_v50, 4  ;;  %v545_v9 = vrot.slane %v484_v51, 4  ;;  %v3077_v50 = vand.u32 4294901760, %v1350_v19  ;;  %v501_v51 = vmul.f32 %v3014_v38, %v491_v25 }
 0x128   : > { %v439_v61 = vsel %vm438_vm7, %v433_v39, %v435_v54  ;;  %v440_v62 = vsel %vm438_vm7, %v435_v54, %v433_v39 }
 0x129   : > { %v449_v8 = vmul.f32 %v3024_v47, %v440_v62  ;;  %v450_v48 = vmul.f32 %v3026_v49, %v439_v61  ;;  %v3107_v21 = vsub.f32 %v1350_v19, %v3077_v50 }
 0x12b   : > { %v567_v11 = vsel %vm566_vm8, %v449_v8, %v538_v1  ;;  %v568_v12 = vsel %vm566_vm8, %v450_v48, %v539_v2  ;;  %v1293_v17 = vpop.permute.xlu1 %1292  ;;  %v505_v18 = vpop.permute.xlu0 %504 }
 0x12c   : > { %v569_v22 = vsel %vm397_vm0, %v567_v11, %v544_v45  ;;  %v570_v24 = vsel %vm397_vm0, %v568_v12, %v545_v9  ;;  %v1294_v31 = vsel %vm506_vm9, %v1291_v53, %v1293_v17  ;;  %v507_v32 = vsel %vm506_vm9, %v2972_v7, %v505_v18 }
 0x12d   : > { %v508_v33 = vsel %vm506_vm9, %v505_v18, %v2972_v7  ;;  %v517_v39 = vmul.f32 %v512_v55, %v507_v32  ;;  %v573_v41 = vsel %vm571_vm10, %v570_v24, %v551_v57  ;;  %v572_v42 = vsel %vm571_vm10, %v569_v22, %v550_v58 }
 0x12e   : > { %v518_v40 = vmul.f32 %v516_v56, %v508_v33  ;;  %v3073_v44 = vand.u32 4294901760, %v573_v41  ;;  %v3075_v46 = vand.u32 4294901760, %v572_v42  ;;  %v1295_v7 = vsel %vm506_vm9, %v1293_v17, %v1291_v53 }
 0x12f   : > { %v1301_v16 = vpop.permute.xlu1 %1300  ;;  %v1299_v26 = vpop.permute.xlu0 %1298  ;;  %v556_v54 = vrot.slane %v517_v39, 6  ;;  %v562_v57 = vrot.slane %v534_v6, 4  ;;  %v1296_v58 = vmul.f32 %v1294_v31, %v512_v55  ;;  %v1297_v8 = vmul.f32 %v1295_v7, %v516_v56 }
 0x130   : > { %v557_v59 = vrot.slane %v518_v40, 6  ;;  %v1303_v61 = vsel %vm523_vm4, %v1301_v16, %v1299_v26  ;;  %v3087_v1 = vsub.f32 %v573_v41, %v3073_v44  ;;  %v3090_v2 = vsub.f32 %v572_v42, %v3075_v46 }
 0x131   : > { %v574_v62 = vsel %vm566_vm8, %v500_v43, %v556_v54  ;;  %v1302_v53 = vsel %vm523_vm4, %v1299_v26, %v1301_v16  ;;  %v1305_v6 = vmul.f32 %v1303_v61, %v3010_v36  ;;  %v1321_v17 = vrot.slane %v2948_v3, 2 }
 0x132   : > { %v575_v63 = vsel %vm566_vm8, %v501_v51, %v557_v59  ;;  %v576_v9 = vsel %vm397_vm0, %v574_v62, %v562_v57  ;;  %v1326_v22 = vrot.slane %v1296_v58, 6  ;;  %v1304_v24 = vmul.f32 %v1302_v53, %v2992_v27 }
 0x133   : > { %v1269_v48 = vpop.permute.xlu1 %1268  ;;  %v1267_v45 = vpop.permute.xlu0 %1266  ;;  %v577_v55 = vsel %vm397_vm0, %v575_v63, %v563_v60  ;;  %v578_v12 = vsel %vm571_vm10, %v576_v9, 0.0  ;;  %v707_v36 = vand.u32 4294901760, %v3087_v1  ;;  %v713_v25 = vand.u32 4294901760, %v3090_v2 }
 0x134   : > { %v579_v11 = vsel %vm571_vm10, %v577_v55, 0.0  ;;  %v1271_v56 = vsel %vm455_vm3, %v1269_v48, %v1267_v45  ;;  %v3104_v20 = vand.u32 4294901760, %v578_v12  ;;  %v1327_v31 = vrot.slane %v1297_v8, 6 }
 0x135   : > { %v3102_v18 = vand.u32 4294901760, %v579_v11  ;;  %v1270_v32 = vsel %vm455_vm3, %v1267_v45, %v1269_v48  ;;  %v1333_v41 = vrot.slane %v1305_v6, 4  ;;  %v3118_v42 = vmul.f32 %v1271_v56, %v2995_v28 }
 0x136   : > { %v700_v19 = vsub.f32 %v578_v12, %v3104_v20  ;;  %v1332_v54 = vrot.slane %v1304_v24, 4  ;;  %v1273_v28 = vmul.f32 %v1270_v32, %v2997_v29  ;;  %v708_v59 = vsub.f32 %v3087_v1, %v707_v36 }
 0x137   : > { %614 = vmatprep.subr.mxu0 %v3102_v18  ;;  %v1285_v33 = vpop.permute.xlu1 %1284  ;;  %v1283_v39 = vpop.permute.xlu0 %1282  ;;  %v694_v40 = vsub.f32 %v579_v11, %v3102_v18  ;;  %v714_v57 = vsub.f32 %v3090_v2, %v713_v25  ;;  %v1320_v61 = vrot.slane %v2942_v0, 2  ;;  %v1308_v62 = vrot.slane %v3118_v42, 6 }
 0x138   : > { %v1286_v27 = vsel %vm489_vm6, %v1283_v39, %v1285_v33  ;;  %v1287_v43 = vsel %vm489_vm6, %v1285_v33, %v1283_v39  ;;  %616 = vmatpush1.msra.mxu0 %v3104_v20  ;;  %v701_v7 = vand.u32 4294901760, %v700_v19  ;;  %v709_v55 = vand.u32 4294901760, %v708_v59 }
 0x139   : > { %v1288_v16 = vmul.f32 %v1286_v27, %v3012_v37  ;;  %v1289_v26 = vmul.f32 %v1287_v43, %v3014_v38  ;;  %618 = vmatprep.subr.mxu0 %v3073_v44  ;;  %v695_v51 = vand.u32 4294901760, %v694_v40  ;;  %v715_v56 = vand.u32 4294901760, %v714_v57 }
 0x13a   : > { %620 = vmatpush1.msra.mxu0 %v3075_v46  ;;  %v702_v53 = vsub.f32 %v700_v19, %v701_v7  ;;  %v1309_v39 = vrot.slane %v1273_v28, 6  ;;  %v1423_v27 = vand.u32 4294901760, %v3107_v21 }
 0x13b   : > { %v1342_v37 = vsel %vm566_vm8, %v1288_v16, %v1326_v22  ;;  %v1343_v38 = vsel %vm566_vm8, %v1289_v26, %v1327_v31  ;;  %787 = vmatprep.subr.mxu0 %v694_v40  ;;  %v1277_v60 = vpop.permute.xlu1 %1276  ;;  %v1275_v58 = vpop.permute.xlu0 %1274  ;;  %659 = vmatmul.mubr.f32.vlgmr.msra.gmra.mxu0 %v658_v10  ;;  %v696_v29 = vsub.f32 %v694_v40, %v695_v51 }
 0x13c   : > { %v1278_v63 = vsel %vm472_vm5, %v1275_v58, %v1277_v60  ;;  %v1279_v8 = vsel %vm472_vm5, %v1277_v60, %v1275_v58  ;;  %790 = vmatpush1.msra.mxu0 %v700_v19  ;;  %829 = vmatprep.mubr.f32.mxu0 %v2647_v5  ;;  %v1345_v0 = vsel %vm397_vm0, %v1343_v38, %v1333_v41  ;;  %v703_v45 = vand.u32 4294901760, %v702_v53 }
 0x13d   : > { %v1280_v48 = vmul.f32 %v1279_v8, %v3000_v30  ;;  %v1281_v52 = vmul.f32 %v1278_v63, %v3007_v34  ;;  %793 = vmatprep.subr.mxu0 %v3087_v1  ;;  %v697_v10 = vand.u32 4294901760, %v696_v29  ;;  %v1347_v9 = vsel %vm571_vm10, %v1345_v0, 0.0 }
 0x13e   : > { %796 = vmatpush1.msra.mxu0 %v3090_v2  ;;  %v1344_v6 = vsel %vm397_vm0, %v1342_v37, %v1332_v54  ;;  %v3154_v34 = vand.u32 4294901760, %v1347_v9 }
 0x13f   : > { %v1314_v11 = vrot.slane %v1280_v48, 4  ;;  %698 = vmatprep.subr.mxu1 %v697_v10  ;;  %947 = vmatprep.subr.mxu0 %v695_v51  ;;  %v1261_v12 = vpop.permute.xlu1 %1260  ;;  %v1259_v30 = vpop.permute.xlu0 %1258  ;;  %v1346_v22 = vsel %vm571_vm10, %v1344_v6, 0.0  ;;  %v1315_v24 = vrot.slane %v1281_v52, 4 }
 0x140   : > { %v1262_v31 = vsel %vm438_vm7, %v1259_v30, %v1261_v12  ;;  %v1263_v32 = vsel %vm438_vm7, %v1261_v12, %v1259_v30  ;;  %704 = vmatpush1.msra.mxu1 %v703_v45  ;;  %832 = vmatmul.mubr.f32.vlgmr.msra.gmra.mxu0 %v2987_v23  ;;  %v3162_v33 = vand.u32 4294901760, %v1346_v22  ;;  %v1461_v41 = vsub.f32 %v1347_v9, %v3154_v34 }
 0x141   : > { %v1264_v40 = vmul.f32 %v1263_v32, %v3024_v47  ;;  %v1265_v19 = vmul.f32 %v1262_v31, %v3026_v49  ;;  %951 = vmatpush1.msra.mxu0 %v701_v7  ;;  %710 = vmatprep.subr.mxu1 %v709_v55  ;;  %v1424_v7 = vsub.f32 %v3107_v21, %v1423_v27 }
 0x142   : > { %955 = vmatprep.subr.mxu0 %v707_v36  ;;  %716 = vmatpush1.msra.mxu1 %v715_v56  ;;  %v1467_v42 = vsub.f32 %v1346_v22, %v3162_v33  ;;  %v1462_v47 = vand.u32 4294901760, %v1461_v41 }
 0x143   : > { %v1336_v43 = vsel %vm566_vm8, %v1264_v40, %v1308_v62  ;;  %v1337_v16 = vsel %vm566_vm8, %v1265_v19, %v1309_v39  ;;  %959 = vmatpush1.msra.mxu0 %v713_v25  ;;  %751 = vmatmul.mubr.f32.vlgmr.msra.gmra.mxu1 %v2977_v14  ;;  %v1425_v59 = vand.u32 4294901760, %v1424_v7 }
 0x144   : > { %v1338_v49 = vsel %vm397_vm0, %v1336_v43, %v1314_v11  ;;  %v1339_v1 = vsel %vm397_vm0, %v1337_v16, %v1315_v24  ;;  %867 = vmatprep.subr.mxu1 %v3102_v18  ;;  %992 = vmatprep.mubr.f32.mxu0 %v2647_v5  ;;  %v1468_v25 = vand.u32 4294901760, %v1467_v42  ;;  %v1463_v3 = vsub.f32 %v1461_v41, %v1462_v47 }
 0x145   : > { %1381 = vmatprep.subr.mxu0 %v3154_v34  ;;  %869 = vmatpush1.msra.mxu1 %v3104_v20  ;;  %v1341_v2 = vsel %vm571_vm10, %v1339_v1, %v1321_v17  ;;  %v1340_v36 = vsel %vm571_vm10, %v1338_v49, %v1320_v61  ;;  %vm1205_vm0 = vcmp.lt.s32.totalorder %v2979_v15, 80 }
 0x146   : > { %994 = vmatmul.mubr.f32.vlgmr.msra.gmra.mxu0 %v2977_v14  ;;  %871 = vmatprep.subr.mxu1 %v3073_v44  ;;  %v1384_v26 = vand.u32 4294901760, %v1341_v2  ;;  %v1386_v51 = vand.u32 4294901760, %v1340_v36  ;;  %v1469_v28 = vsub.f32 %v1467_v42, %v1468_v25  ;;  %v1464_v38 = vand.u32 4294901760, %v1463_v3 }
 0x147   : > { %1383 = vmatpush1.msra.mxu0 %v3162_v33  ;;  %873 = vmatpush1.msra.mxu1 %v3075_v46 }
 0x148   : > { %906 = vmatprep.mubr.f32.mxu1 %v2647_v5  ;;  %1029 = vmatprep.subr.mxu1 %v3102_v18  ;;  %v1473_v17 = vsub.f32 %v1341_v2, %v1384_v26  ;;  %v1479_v54 = vsub.f32 %v1340_v36, %v1386_v51 }
 0x149   : > { %910 = vmatmul.mubr.f32.vlgmr.msra.gmra.mxu1 %v656_v35  ;;  %1385 = vmatprep.subr.mxu0 %v1384_v26  ;;  %v1470_v35 = vand.u32 4294901760, %v1469_v28 }
 0x14a   : > { %1031 = vmatpush1.msra.mxu1 %v3104_v20  ;;  %1068 = vmatprep.mubr.f32.mxu1 %v2647_v5  ;;  %v1474_v57 = vand.u32 4294901760, %v1473_v17  ;;  %v1480_v37 = vand.u32 4294901760, %v1479_v54 }
 0x14b   : > { %1033 = vmatprep.subr.mxu1 %v3073_v44  ;;  %1387 = vmatpush1.msra.mxu0 %v1386_v51 }
 0x14c   : > { %1035 = vmatpush1.msra.mxu1 %v3075_v46  ;;  %1420 = vmatprep.mubr.f32.mxu0 %v2647_v5  ;;  %v1475_v18 = vsub.f32 %v1473_v17, %v1474_v57  ;;  %v1481_v23 = vsub.f32 %v1479_v54, %v1480_v37 }
 0x14d   : > { %1070 = vmatmul.mubr.f32.vlgmr.msra.gmra.mxu1 %v2977_v14  ;;  %1465 = vmatprep.subr.mxu1 %v1464_v38 }
 0x14e   : > { %1554 = vmatprep.subr.mxu0 %v1461_v41  ;;  %1426 = vmatmul.mubr.f32.vlgmr.msra.gmra.mxu0 %v1425_v59  ;;  %v1476_v20 = vand.u32 4294901760, %v1475_v18  ;;  %v1482_v60 = vand.u32 4294901760, %v1481_v23 }
 0x14f   : > { %1471 = vmatpush1.msra.mxu1 %v1470_v35  ;;  %1557 = vmatpush1.msra.mxu0 %v1467_v42 }
 0x150   : > { %1560 = vmatprep.subr.mxu0 %v1473_v17  ;;  %1596 = vmatprep.mubr.f32.mxu0 %v2647_v5 }
 0x151   : > { %1563 = vmatpush1.msra.mxu0 %v1479_v54  ;;  %1477 = vmatprep.subr.mxu1 %v1476_v20 }
 0x152   : > { %1714 = vmatprep.subr.mxu0 %v1462_v47  ;;  %1599 = vmatmul.mubr.f32.vlgmr.msra.gmra.mxu0 %v3107_v21 }
 0x153   : > { %1718 = vmatpush1.msra.mxu0 %v1468_v25  ;;  %1483 = vmatpush1.msra.mxu1 %v1482_v60 }
 0x154   : > { %1722 = vmatprep.subr.mxu0 %v1474_v57  ;;  %1516 = vmatprep.mubr.f32.mxu1 %v2647_v5 }
 0x155   : > { %1726 = vmatpush1.msra.mxu0 %v1480_v37  ;;  %1634 = vmatprep.subr.mxu1 %v3154_v34 }
 0x156   : > { %1518 = vmatmul.mubr.f32.vlgmr.msra.gmra.mxu1 %v3077_v50  ;;  %1759 = vmatprep.mubr.f32.mxu0 %v2647_v5 }
 0x157   : > { %1636 = vmatpush1.msra.mxu1 %v3162_v33  ;;  %1673 = vmatprep.mubr.f32.mxu1 %v2647_v5 }
 0x158   : > { %1638 = vmatprep.subr.mxu1 %v1384_v26  ;;  %1761 = vmatmul.mubr.f32.vlgmr.msra.gmra.mxu0 %v3077_v50 }
 0x159   : > { %1640 = vmatpush1.msra.mxu1 %v1386_v51 }
 0x15a   : > { %1796 = vmatprep.subr.mxu1 %v3154_v34  ;;  %1677 = vmatmul.mubr.f32.vlgmr.msra.gmra.mxu1 %v1423_v27 }
 0x15b   : > { %1798 = vmatpush1.msra.mxu1 %v3162_v33  ;;  %1835 = vmatprep.mubr.f32.mxu1 %v2647_v5 }
 0x15c   : > { %1800 = vmatprep.subr.mxu1 %v1384_v26 }
 0x15d   : > { %1802 = vmatpush1.msra.mxu1 %v1386_v51 }
 0x15e   : > { %1837 = vmatmul.mubr.f32.vlgmr.msra.gmra.mxu1 %v3077_v50 }
 0x1fb   : > { %v660_v14 = vpop.f32.mrf.mxu0 }
 0x1fd   : > { %v662_v44 = vpop.f32.mrf.mxu0 }
 0x200   : > { %v833_v46 = vpop.f32.mrf.mxu0 }
 0x202   : > { %v835_v61 = vpop.f32.mrf.mxu0 }
 0x203   : > { %v752_v58 = vpop.f32.mrf.mxu1 }
 0x204   : > { %v753_v29 = vadd.f32 %v752_v58, %v660_v14 }
 0x205   : > { %v754_v62 = vpop.f32.mrf.mxu1 }
 0x206   : > { %v834_v63 = vadd.f32 %v833_v46, %v753_v29  ;;  %v755_v8 = vadd.f32 %v754_v62, %v662_v44  ;;  %v995_v21 = vpop.f32.mrf.mxu0 }
 0x208   : > { %v836_v53 = vadd.f32 %v835_v61, %v755_v8  ;;  %v997_v45 = vpop.f32.mrf.mxu0 }
 0x209   : > { %v911_v48 = vpop.f32.mrf.mxu1 }
 0x20a   : > { %v912_v52 = vadd.f32 %v911_v48, %v834_v63 }
 0x20b   : > { %v913_v10 = vpop.f32.mrf.mxu1 }
 0x20c   : > { %v996_v0 = vadd.f32 %v995_v21, %v912_v52  ;;  %v914_v5 = vadd.f32 %v913_v10, %v836_v53  ;;  %v3271_v10 = vld [vmem:[#allocation8] sm:$0x7f] }
 0x20d   : > { %v1071_v55 = vpop.f32.mrf.mxu1 }
 0x20e   : > { %v998_v9 = vadd.f32 %v997_v45, %v914_v5  ;;  %v3218_v50 = vadd.f32 %v1071_v55, %v996_v0  ;;  %v1427_v6 = vpop.f32.mrf.mxu0  ;;  %v3276_v5 = vld [vmem:[#allocation8 + $0x8] sm:$0x7f] }
 0x20f   : > { %v1073_v11 = vpop.f32.mrf.mxu1 }
 0x210   : > { %v3220_v12 = vadd.f32 %v1073_v11, %v998_v9  ;;  %1076 = vrot.lane.b32.xlu0 %v3218_v50, %s2648_s20  ;;  %v1429_v30 = vpop.f32.mrf.mxu0  ;;  %v1095_v56 = vrot.slane %v3218_v50, 1  ;;  %v1122_v24 = vrot.slane %v3218_v50, 2  ;;  %v1147_v42 = vrot.slane %v3218_v50, 4 }
 0x211   : > { %v1172_v2 = vrot.slane %v3218_v50, 5  ;;  %v1197_v3 = vrot.slane %v3218_v50, 6  ;;  %v1108_v9 = vrot.slane %v3271_v10, 1 }
 0x212   : > { %1078 = vrot.lane.b32.xlu1 %v3220_v12, %s2648_s20  ;;  %v1096_v34 = vrot.slane %v3220_v12, 1  ;;  %v1600_v22 = vpop.f32.mrf.mxu0  ;;  %v1123_v33 = vrot.slane %v3220_v12, 2  ;;  %v1148_v16 = vrot.slane %v3220_v12, 4  ;;  %v1173_v25 = vrot.slane %v3220_v12, 5 }
 0x213   : > { %v1198_v54 = vrot.slane %v3220_v12, 6 }
 0x214   : > { %1099 = vrot.lane.b32.xlu0 %v1095_v56, %s2649_s17  ;;  %v1602_v19 = vpop.f32.mrf.mxu0 }
 0x216   : > { %1101 = vrot.lane.b32.xlu1 %v1096_v34, %s2649_s17  ;;  %v1519_v31 = vpop.f32.mrf.mxu1 }
 0x217   : > { %v1520_v32 = vadd.f32 %v1519_v31, %v1427_v6  ;;  %v1109_v6 = vrot.slane %v3276_v5, 1  ;;  %v1134_v31 = vrot.slane %v3276_v5, 2 }
 0x218   : > { %1126 = vrot.lane.b32.xlu0 %v1122_v24, %s2650_s21  ;;  %v1521_v39 = vpop.f32.mrf.mxu1  ;;  %v1762_v49 = vpop.f32.mrf.mxu0  ;;  %v1133_v24 = vrot.slane %v3271_v10, 2 }
 0x219   : > { %v1522_v40 = vadd.f32 %v1521_v39, %v1429_v30  ;;  %v1601_v41 = vadd.f32 %v1600_v22, %v1520_v32 }
 0x21a   : > { %1128 = vrot.lane.b32.xlu1 %v1123_v33, %s2650_s21  ;;  %v1678_v27 = vpop.f32.mrf.mxu1  ;;  %v1764_v26 = vpop.f32.mrf.mxu0 }
 0x21b   : > { %v1603_v43 = vadd.f32 %v1602_v19, %v1522_v40  ;;  %v1679_v1 = vadd.f32 %v1678_v27, %v1601_v41  ;;  %v1159_v27 = vrot.slane %v3276_v5, 4 }
 0x21c   : > { %1151 = vrot.lane.b32.xlu0 %v1147_v42, %s2651_s12  ;;  %v1680_v47 = vpop.f32.mrf.mxu1  ;;  %v1158_v42 = vrot.slane %v3271_v10, 4 }
 0x21d   : > { %v1681_v36 = vadd.f32 %v1680_v47, %v1603_v43  ;;  %v1763_v7 = vadd.f32 %v1762_v49, %v1679_v1  ;;  %v1183_v1 = vrot.slane %v3271_v10, 5 }
 0x21e   : > { %1153 = vrot.lane.b32.xlu1 %v1148_v16, %s2651_s12  ;;  %v1838_v51 = vpop.f32.mrf.mxu1 }
 0x21f   : > { %v1765_v17 = vadd.f32 %v1764_v26, %v1681_v36  ;;  %v3244_v59 = vadd.f32 %v1838_v51, %v1763_v7  ;;  %v1208_v36 = vrot.slane %v3271_v10, 6 }
 0x220   : > { %1176 = vrot.lane.b32.xlu0 %v1172_v2, %s2652_s1  ;;  %v1840_v28 = vpop.f32.mrf.mxu1  ;;  %v1184_v2 = vrot.slane %v3276_v5, 5 }
 0x221   : > { %v3246_v57 = vadd.f32 %v1840_v28, %v1765_v17  ;;  %v1861_v37 = vrot.slane %v3244_v59, 1  ;;  %v1881_v18 = vrot.slane %v3244_v59, 2  ;;  %v1901_v35 = vrot.slane %v3244_v59, 4 }
 0x222   : > { %1178 = vrot.lane.b32.xlu1 %v1173_v25, %s2652_s1  ;;  %v1921_v60 = vrot.slane %v3244_v59, 5  ;;  %v1941_v44 = vrot.slane %v3244_v59, 6 }
 0x223   : > { %v1862_v38 = vrot.slane %v3246_v57, 1  ;;  %v1882_v23 = vrot.slane %v3246_v57, 2  ;;  %v1902_v20 = vrot.slane %v3246_v57, 4  ;;  %v1922_v14 = vrot.slane %v3246_v57, 5 }
 0x224   : > { %1201 = vrot.lane.b32.xlu0 %v1197_v3, %s2653_s0  ;;  %v1942_v46 = vrot.slane %v3246_v57, 6 }
 0x226   : > { %1203 = vrot.lane.b32.xlu1 %v1198_v54, %s2653_s0  ;;  %v1209_v54 = vrot.slane %v3276_v5, 6 }
 0x228   : > { %1843 = vrot.lane.b32.xlu0 %v3244_v59, %s2648_s20 }
 0x22a   : > { %1845 = vrot.lane.b32.xlu1 %v3246_v57, %s2648_s20  ;;  %s3397_s20 = scalar_lea.hbm %s3468_s7, %s2239_s16 }
 0x22c   : > { %1865 = vrot.lane.b32.xlu0 %v1861_v37, %s2649_s17 }
 0x22e   : > { %1867 = vrot.lane.b32.xlu1 %v1862_v38, %s2649_s17  ;;  %s2527_s17 = scalar_lea.vmem %s3392_s19, 128 }
 0x22f   : > { %p2528_p0 = scmp.ne.s32.totalorder %s3392_s19, %s2527_s17 }
 0x230   : > { %1885 = vrot.lane.b32.xlu0 %v1881_v18, %s2650_s21 }
 0x231   : > { %p2529_p4 = pnand %p2528_p0, %p3501_p2 }
 0x232   : > { %1887 = vrot.lane.b32.xlu1 %v1882_v23, %s2650_s21  ;;  %s2654_s21 = smov [#allocation12]  }
 0x233   : > { %p2530_p6 = pneg %p2529_p4 }
 0x234   : > { %1905 = vrot.lane.b32.xlu0 %v1901_v35, %s2651_s12 }
 0x236   : > { %1907 = vrot.lane.b32.xlu1 %v1902_v20, %s2651_s12  ;;  %s2531_s12 = sshll.u32 %s2654_s21, 4  ;;  %s2532_s12 = int_to_ptr.vmem [resolvable:$false] %s2531_s12 }
 0x237   : > { %p2534_p8 = scmp.lt.s32.totalorder %s3392_s19, %s2532_s12 }
 0x238   : > { %1925 = vrot.lane.b32.xlu0 %v1921_v60, %s2652_s1 }
 0x23a   : > { %1927 = vrot.lane.b32.xlu1 %v1922_v14, %s2652_s1  ;;  %s2533_s1 = scalar_lea.vmem %s2532_s12, 256 }
 0x23b   : > { %p2535_p3 = scmp.lt.s32.totalorder %s2533_s1, %s2527_s17 }
 0x23c   : > { %1945 = vrot.lane.b32.xlu0 %v1941_v44, %s2653_s0 }
 0x23d   : > { %p2536_p12 = por %p2535_p3, %p2534_p8 }
 0x23e   : > { %1947 = vrot.lane.b32.xlu1 %v1942_v46, %s2653_s0 }
 0x23f   : > { %p2537_p9 = pnand %p2536_p12, %p2530_p6 }
 0x282   : > { %v1077_v58 = vpop.permute.xlu0 %1076 }
 0x284   : > { %v1079_v29 = vpop.permute.xlu1 %1078 }
 0x285   : > { %v1082_v0 = vsel %vm1080_vm11, %v1079_v29, %v1077_v58  ;;  %v1081_v45 = vsel %vm1080_vm11, %v1077_v58, %v1079_v29 }
 0x286   : > { %v1100_v61 = vpop.permute.xlu0 %1099  ;;  %v1083_v11 = vmul.f32 %v1082_v0, %v3271_v10  ;;  %v1084_v22 = vmul.f32 %v1081_v45, %v3276_v5 }
 0x288   : > { %v1102_v62 = vpop.permute.xlu1 %1101  ;;  %v1087_v41 = vrot.slane %v1083_v11, 5  ;;  %v1088_v16 = vrot.slane %v1084_v22, 5 }
 0x289   : > { %v1104_v30 = vsel %vm1103_vm12, %v1100_v61, %v1102_v62  ;;  %v1105_v56 = vsel %vm1103_vm12, %v1102_v62, %v1100_v61 }
 0x28a   : > { %v1127_v63 = vpop.permute.xlu0 %1126  ;;  %v1112_v40 = vmul.f32 %v1108_v9, %v1105_v56  ;;  %v1113_v19 = vmul.f32 %v1109_v6, %v1104_v30  ;;  %v1091_v17 = vadd.f32 %v1087_v41, %v3218_v50  ;;  %v1092_v18 = vadd.f32 %v1088_v16, %v3220_v12 }
 0x28c   : > { %v1129_v8 = vpop.permute.xlu1 %1128  ;;  %v1116_v26 = vrot.slane %v1112_v40, 5  ;;  %v1117_v51 = vrot.slane %v1113_v19, 5 }
 0x28d   : > { %v1131_v32 = vsel %vm1130_vm13, %v1127_v63, %v1129_v8  ;;  %v1132_v33 = vsel %vm1130_vm13, %v1129_v8, %v1127_v63 }
 0x28e   : > { %v1152_v53 = vpop.permute.xlu0 %1151  ;;  %v1137_v47 = vmul.f32 %v1133_v24, %v1132_v33  ;;  %v1138_v49 = vmul.f32 %v1134_v31, %v1131_v32  ;;  %v1120_v58 = vadd.f32 %v1116_v26, %v1091_v17  ;;  %v1121_v12 = vadd.f32 %v1117_v51, %v1092_v18 }
 0x290   : > { %v1154_v21 = vpop.permute.xlu1 %1153  ;;  %v1141_v23 = vrot.slane %v1137_v47, 5  ;;  %v1142_v35 = vrot.slane %v1138_v49, 5 }
 0x291   : > { %v1156_v7 = vsel %vm1155_vm14, %v1152_v53, %v1154_v21  ;;  %v1157_v3 = vsel %vm1155_vm14, %v1154_v21, %v1152_v53 }
 0x292   : > { %v1177_v48 = vpop.permute.xlu0 %1176  ;;  %v1162_v60 = vmul.f32 %v1158_v42, %v1156_v7  ;;  %v1163_v50 = vmul.f32 %v1159_v27, %v1157_v3  ;;  %v1145_v56 = vadd.f32 %v1141_v23, %v1120_v58 }
 0x294   : > { %v1179_v52 = vpop.permute.xlu1 %1178  ;;  %v1167_v22 = vrot.slane %v1163_v50, 5 }
 0x295   : > { %v1181_v20 = vsel %vm1180_vm15, %v1177_v48, %v1179_v52  ;;  %v1182_v62 = vsel %vm1180_vm15, %v1179_v52, %v1177_v48  ;;  %v1146_v48 = vadd.f32 %v1142_v35, %v1121_v12  ;;  %v1166_v52 = vrot.slane %v1162_v60, 5 }
 0x296   : > { %v1202_v55 = vpop.permute.xlu0 %1201  ;;  %v1187_v63 = vmul.f32 %v1183_v1, %v1181_v20  ;;  %v1188_v33 = vmul.f32 %v1184_v2, %v1182_v62 }
 0x297   : > { %v1171_v26 = vadd.f32 %v1167_v22, %v1146_v48 }
 0x298   : > { %v1204_v34 = vpop.permute.xlu1 %1203  ;;  %v1192_v3 = vrot.slane %v1188_v33, 5 }
 0x299   : > { %v1206_v8 = vsel %vm1205_vm0, %v1202_v55, %v1204_v34  ;;  %v1207_v53 = vsel %vm1205_vm0, %v1204_v34, %v1202_v55 }
 0x29a   : > { %v1844_v39 = vpop.permute.xlu0 %1843  ;;  %v1212_v55 = vmul.f32 %v1208_v36, %v1206_v8 }
 0x29c   : > { %v1846_v43 = vpop.permute.xlu1 %1845 }
 0x29d   : > { %v1847_v28 = vsel %vm1080_vm11, %v1844_v39, %v1846_v43  ;;  %v1848_v37 = vsel %vm1080_vm11, %v1846_v43, %v1844_v39  ;;  %v1213_v39 = vmul.f32 %v1209_v54, %v1207_v53 }
 0x29e   : > { %v1866_v25 = vpop.permute.xlu0 %1865  ;;  %v1849_v29 = vmul.f32 %v1848_v37, %v3271_v10  ;;  %v1850_v61 = vmul.f32 %v1847_v28, %v3276_v5 }
 0x2a0   : > { %v1868_v38 = vpop.permute.xlu1 %1867  ;;  %v1853_v34 = vrot.slane %v1849_v29, 5 }
 0x2a1   : > { %v1869_v14 = vsel %vm1103_vm12, %v1866_v25, %v1868_v38  ;;  %v1870_v44 = vsel %vm1103_vm12, %v1868_v38, %v1866_v25  ;;  %v1170_v25 = vadd.f32 %v1166_v52, %v1145_v56  ;;  %v1217_v38 = vrot.slane %v1213_v39, 5 }
 0x2a2   : > { %v1886_v46 = vpop.permute.xlu0 %1885  ;;  %v1871_v0 = vmul.f32 %v1870_v44, %v1108_v9  ;;  %v1872_v45 = vmul.f32 %v1869_v14, %v1109_v6  ;;  %v1854_v9 = vrot.slane %v1850_v61, 5  ;;  %v1191_v6 = vrot.slane %v1187_v63, 5 }
 0x2a3   : > { %v1857_v17 = vadd.f32 %v1853_v34, %v3244_v59  ;;  %v1196_v44 = vadd.f32 %v1192_v3, %v1171_v26 }
 0x2a4   : > { %v1888_v21 = vpop.permute.xlu1 %1887  ;;  %v1875_v43 = vrot.slane %v1871_v0, 5  ;;  %v1876_v16 = vrot.slane %v1872_v45, 5  ;;  %v1858_v28 = vadd.f32 %v1854_v9, %v3246_v57  ;;  %v1195_v37 = vadd.f32 %v1191_v6, %v1170_v25 }
 0x2a5   : > { %v1889_v11 = vsel %vm1130_vm13, %v1886_v46, %v1888_v21  ;;  %v1890_v30 = vsel %vm1130_vm13, %v1888_v21, %v1886_v46  ;;  %v1221_v8 = vadd.f32 %v1217_v38, %v1196_v44 }
 0x2a6   : > { %v1906_v32 = vpop.permute.xlu0 %1905  ;;  %v1891_v40 = vmul.f32 %v1890_v30, %v1133_v24  ;;  %v1892_v19 = vmul.f32 %v1889_v11, %v1134_v31  ;;  %v1216_v31 = vrot.slane %v1212_v55, 5  ;;  %v1879_v20 = vadd.f32 %v1875_v43, %v1857_v17 }
 0x2a7   : > { %v1880_v60 = vadd.f32 %v1876_v16, %v1858_v28  ;;  %v1963_v22 = vmul.f32 1.442695, %v1221_v8 }
 0x2a8   : > { %v1908_v41 = vpop.permute.xlu1 %1907  ;;  %v1895_v18 = vrot.slane %v1891_v40, 5  ;;  %v1896_v23 = vrot.slane %v1892_v19, 5  ;;  %v1220_v46 = vadd.f32 %v1216_v31, %v1195_v37  ;;  %v1979_v40 = vsub.s32 3, %v2975_v13  ;;  %v1994_v19 = vld [vmem:[%s348_s18] sm:$0xff]  ;;  %v2366_v31 = vld [vmem:[%s339_s29] sm:$0xff]  ;;  %s388_s18 = scalar_lea.vmem [#allocation13], %s2894_s22 }
 0x2a9   : > { %v1909_v47 = vsel %vm1155_vm14, %v1906_v32, %v1908_v41  ;;  %v1910_v49 = vsel %vm1155_vm14, %v1908_v41, %v1906_v32  ;;  %v2004_v26 = vcombine.high %v1994_v19, %v1994_v19  ;;  %s2047_s13 = sshll.u32 %s388_s18, 4  ;;  %s2014_s22 = scalar_lea.sflag [#allocation4], %s2891_s9  ;;  %s3399_s13 = int_to_ptr.vmem [resolvable:$true] %s2047_s13 }
 0x2aa   : > { %v1911_v51 = vmul.f32 %v1909_v47, %v1158_v42  ;;  %v1912_v24 = vmul.f32 %v1910_v49, %v1159_v27  ;;  %v1926_v7 = vpop.permute.xlu0 %1925  ;;  %v1899_v58 = vadd.f32 %v1895_v18, %v1879_v20  ;;  %v1900_v12 = vadd.f32 %v1896_v23, %v1880_v60 }
 0x2ab   : > { %v1961_v11 = vmul.f32 1.442695, %v1220_v46 }
 0x2ac   : > { %v1928_v35 = vpop.permute.xlu1 %1927  ;;  %v1915_v50 = vrot.slane %v1911_v51, 5  ;;  %v1916_v14 = vrot.slane %v1912_v24, 5 }
 0x2ad   : > { %v1929_v42 = vsel %vm1180_vm15, %v1926_v7, %v1928_v35  ;;  %v1930_v27 = vsel %vm1180_vm15, %v1928_v35, %v1926_v7  ;;  %2354 = vpow2.f32 %v1961_v11 }
 0x2ae   : > { %v1931_v59 = vmul.f32 %v1929_v42, %v1183_v1  ;;  %v1932_v57 = vmul.f32 %v1930_v27, %v1184_v2  ;;  %v1946_v62 = vpop.permute.xlu0 %1945  ;;  %v1919_v0 = vadd.f32 %v1915_v50, %v1899_v58  ;;  %v1920_v1 = vadd.f32 %v1916_v14, %v1900_v12 }
 0x2af   : > { %2356 = vpow2.f32 %v1963_v22 }
 0x2b0   : > { %v1935_v29 = vrot.slane %v1931_v59, 5  ;;  %v1936_v61 = vrot.slane %v1932_v57, 5  ;;  %v1948_v63 = vpop.permute.xlu1 %1947 }
 0x2b1   : > { %v1949_v53 = vsel %vm1205_vm0, %v1946_v62, %v1948_v63  ;;  %v1950_v21 = vsel %vm1205_vm0, %v1948_v63, %v1946_v62 }
 0x2b2   : > { %v1951_v2 = vmul.f32 %v1949_v53, %v1208_v36  ;;  %v1952_v45 = vmul.f32 %v1950_v21, %v1209_v54  ;;  %v1939_v30 = vadd.f32 %v1935_v29, %v1919_v0  ;;  %v1940_v56 = vadd.f32 %v1936_v61, %v1920_v1 }
 0x2b4   : > { %v1955_v48 = vrot.slane %v1951_v2, 5  ;;  %v1956_v52 = vrot.slane %v1952_v45, 5 }
 0x2b6   : > { %v1959_v32 = vadd.f32 %v1955_v48, %v1939_v30  ;;  %v1960_v33 = vadd.f32 %v1956_v52, %v1940_v56 }
 0x2b8   : > { %v1965_v55 = vmul.f32 1.442695, %v1959_v32  ;;  %v1967_v15 = vmul.f32 1.442695, %v1960_v33 }
 0x2ba   : > { %2358 = vpow2.f32 %v1965_v55  ;;  %v2355_v10 = vpop.eup %2354 }
 0x2bb   : > { %2360 = vpow2.f32 %v1967_v15 }
 0x2bc   : > { %v2357_v36 = vpop.eup %2356 }
 0x2c7   : > { %v2359_v34 = vpop.eup %2358 }
 0x2c8   : > { %v2361_v5 = vpop.eup %2360  ;;  %v1969_v54 = vadd.f32 %v2359_v34, %v2355_v10 }
 0x2c9   : > { %v1970_v9 = vadd.f32 %v2361_v5, %v2357_v36 }
 0x2ca   : > { %v1971_v6 = vadd.f32 1e-10, %v1969_v54 }
 0x2cb   : > { %v1972_v39 = vadd.f32 1e-10, %v1970_v9 }
 0x2cc   : > { %2362 = vrcp.f32 %v1971_v6 }
 0x2cd   : > { %2364 = vrcp.f32 %v1972_v39 }
 0x2d9   : > { %v2363_v41 = vpop.eup %2362 }
 0x2da   : > { %v2365_v43 = vpop.eup %2364  ;;  %v1975_v16 = vmul.f32 %v2363_v41, %v2355_v10  ;;  %v1992_v47 = vmul.f32 %v2363_v41, %v2359_v34 }
 0x2db   : > { %v1976_v49 = vmul.f32 %v2365_v43, %v2357_v36  ;;  %v1993_v25 = vmul.f32 %v2365_v43, %v2361_v5 }
 0x2dc   : > { %v1980_v51 = vrot.slane %v1975_v16, %v1979_v40  ;;  %v1998_v24 = vrot.slane %v1992_v47, %v1979_v40 }
 0x2dd   : > { %v1984_v7 = vrot.slane %v1976_v49, %v1979_v40  ;;  %v2002_v3 = vrot.slane %v1993_v25, %v1979_v40 }
 0x2de   : > { %v1985_v17 = vmul.f32 %v2366_v31, %v1980_v51  ;;  %v2006_v13 = vmul.f32 %v1998_v24, %v1994_v19 }
 0x2df   : > { %v1986_v28 = vmul.f32 %v1984_v7, %v2908_v4  ;;  %v2007_v37 = vmul.f32 %v2004_v26, %v2002_v3 }
 0x2e1   : > { %v1989_v38 = vcombine.low %v1985_v17, %v1986_v28  ;;  %v2010_v18 = vcombine.low %v2006_v13, %v2007_v37 }
 0x2e3   : > { %1991 = vst [vmem:[%s381_s30] sm:$0xff] %v1989_v38  ;;  %2012 = vst [vmem:[%s388_s18] sm:$0xff] %v2010_v18 }
 0x2e4   : > { %2540 = shalt.err (!%p2537_p9)
}
 0x2e5   : > { %s2541_s0 = scalar_lea.hbm %s3390_s23, 128  ;;  %s2545_s18 = scalar_lea.hbm %s3467_s6, 256 }
 0x2e6   : > { %p2542_p10 = scmp.ne.s32.totalorder %s3390_s23, %s2541_s0  ;;  %p2546_p13 = scmp.lt.s32.totalorder %s3390_s23, %s3467_s6 }
 0x2e7   : > { %p2547_p5 = scmp.lt.s32.totalorder %s2545_s18, %s2541_s0 }
 0x2e8   : > { %p2543_p7 = pnand %p2542_p10, %p3501_p2 }
 0x2e9   : > { %p2548_p1 = por %p2547_p5, %p2546_p13 }
 0x2ea   : > { %p2544_p11 = pneg %p2543_p7 }
 0x2ec   : > { %p2549_p0 = pnand %p2548_p1, %p2544_p11 }
 0x2ee   : > { %2552 = shalt.err (!%p2549_p0)
}
 0x2ef   : > { %2261 = dma.vmem_to_hbm [thread:$0]  (%p3501_p2), %s3392_s19, 128, %s3390_s23, %s2014_s22  }
 0x2f0   : > { %s2019_s28 = scalar_lea.sflag [#allocation14], %s2891_s9  ;;  %s2553_s29 = scalar_lea.vmem %s3399_s13, 128 }
 0x2f1   : > { %p2554_p4 = scmp.ne.s32.totalorder %s3399_s13, %s2553_s29  ;;  %s2655_s17 = smov [#allocation13]  }
 0x2f2   : > { %s2557_s21 = sshll.u32 %s2655_s17, 4  ;;  %s2558_s21 = int_to_ptr.vmem [resolvable:$false] %s2557_s21 }
 0x2f3   : > { %p2555_p6 = pnand %p2554_p4, %p3501_p2  ;;  %s2559_s12 = scalar_lea.vmem %s2558_s21, 256 }
 0x2f4   : > { %p2560_p3 = scmp.lt.s32.totalorder %s3399_s13, %s2558_s21  ;;  %p2561_p12 = scmp.lt.s32.totalorder %s2559_s12, %s2553_s29 }
 0x2f5   : > { %p2556_p8 = pneg %p2555_p6 }
 0x2f6   : > { %p2562_p9 = por %p2561_p12, %p2560_p3 }
 0x2f8   : > { %p2563_p10 = pnand %p2562_p9, %p2556_p8 }
 0x2fa   : > { %2566 = shalt.err (!%p2563_p10)
}
 0x2fb   : > { %s2567_s19 = scalar_lea.hbm %s3397_s20, 128  ;;  %s2571_s22 = scalar_lea.hbm %s3468_s7, 256 }
 0x2fc   : > { %p2568_p7 = scmp.ne.s32.totalorder %s3397_s20, %s2567_s19  ;;  %p2572_p5 = scmp.lt.s32.totalorder %s3397_s20, %s3468_s7 }
 0x2fd   : > { %p2573_p1 = scmp.lt.s32.totalorder %s2571_s22, %s2567_s19 }
 0x2fe   : > { %p2569_p11 = pnand %p2568_p7, %p3501_p2 }
 0x2ff   : > { %p2574_p0 = por %p2573_p1, %p2572_p5 }
 0x300   : > { %p2570_p13 = pneg %p2569_p11 }
 0x302   : > { %p2575_p4 = pnand %p2574_p0, %p2570_p13 }
 0x304   : > { %2578 = shalt.err (!%p2575_p4)
}
 0x305   : > { %2262 = dma.vmem_to_hbm [thread:$0]  (%p3501_p2), %s3399_s13, 128, %s3397_s20, %s2019_s28  }
 0x306 PF: > { %s2059_s16 = sand.u32 1, %s2621_s24   ;;  %p3502_p6 = scmp.ne.s32.totalorder %s3479_s8, 0 }
 0x307   : > { %p3503_p8 = scmp.ge.s32.totalorder %s2633_s27, 2  ;;  %s2060_s30 = scalar_lea.sflag [#allocation4], %s2059_s16 }
 0x309   : > { %p2286_p3 = pnand %p3503_p8, %p3502_p6 }
 0x30b   : > { %p2287_p12 = pneg %p2286_p3 }
 0x30d   : > { %2612 = dma.done.wait (%p2287_p12), %s2060_s30, 128  }
 0x30e   : > { %2614 = vsyncadd (%p2287_p12), %s2060_s30, 4294967168  ;;  %s2069_s18 = scalar_lea.sflag [#allocation14], %s2059_s16 }
 0x30f   : > { %2616 = dma.done.wait (%p2287_p12), %s2069_s18, 128  }
 0x310   : > { %2618 = vsyncadd (%p2287_p12), %s2069_s18, 4294967168  ;;  %s3504_s10 = sld [smem:[#allocation21_spill]]  ;;  %p24_p2 = scmp.ge.s32.totalorder %s2750_s15, 4  }
 0x311   : > { %s3505_s24 = smov %s2625_s25  ;;  %s3506_s25 = smov %s2629_s26 }
 0x312   : > { %s3508_s27 = smov %s2750_s15  ;;  %26 = sbr.rel (!%p24_p2) target bundleno = 11 (0xb), region = 132 }
 0x316   : > { %s3507_s26 = smov %s3504_s10 }
 0x317   :  { %2074 = vsyncpa [#allocation3], 1 }
 0x318   :  { %2076 = vsyncpa [#allocation3 + $0x1], 1 }
 0x319   :  { %2077 = vsyncpa [#allocation6], 1 }
 0x31a   :  { %2078 = vsyncpa [#allocation9], 1 }
 0x31b   :  { %2079 = vsyncpa [#allocation4], 1 }
 0x31c   :  { %2081 = vsyncpa [#allocation4 + $0x1], 1 }
 0x31d   :  { %2082 = vsyncpa [#allocation14], 1 }
 0x31e   :  { %2084 = vsyncpa [#allocation14 + $0x1], 1 }

</bundles_post_ra>
